<compile_context>
chip_gen: v7x
topology: tpu7x:2x2x1
jax: 0.10.0
libtpu: 0.0.40
codegen_flags: <defaults>
</compile_context>

<pallas_src>
import functools

import jax
import jax.numpy as jnp
from jax.experimental import pallas as pl
from jax.experimental.pallas import tpu as pltpu


def _round_up(x, m):
    return ((x + m - 1) // m) * m


def _device_kind():
    try:
        return jax.devices()[0].device_kind.lower()
    except Exception:
        return ""


def _mlcl_kernel(fq_ref, fk_ref, lq_ref, lkT_ref, out_ref,
                 m_sc, l_sc, sml_sc, sm_sc,
                 *, actual_b, tq, tk, inv_t, int_labels):
    qi = pl.program_id(0)
    ki = pl.program_id(1)

    @pl.when(ki == 0)
    def _():
        m_sc[...] = jnp.full_like(m_sc, -jnp.inf)
        l_sc[...] = jnp.zeros_like(l_sc)
        sml_sc[...] = jnp.zeros_like(sml_sc)
        sm_sc[...] = jnp.zeros_like(sm_sc)

    # logits tile: feats_q . feats_k^T  (bf16 MXU operands, f32 accumulation,
    # contraction on dim 1 of BOTH operands -> no transpose pass).  The
    # 1/temperature scale is applied on the f32 tile inside the kernel.
    logits = jax.lax.dot_general(
        fq_ref[...], fk_ref[...],
        dimension_numbers=(((1,), (1,)), ((), ())),
        preferred_element_type=jnp.float32) * inv_t               # [tq, tk]

    # label-overlap tile (kv labels pre-transposed -> plain NN matmul).
    # int8 x int8 -> int32 on v5e/v6e, bf16 -> f32 elsewhere; exact for
    # multi-hot {0,1} labels either way.
    overlap = jax.lax.dot_general(
        lq_ref[...], lkT_ref[...],
        dimension_numbers=(((1,), (0,)), ((), ())),
        preferred_element_type=jnp.int32 if int_labels else jnp.float32)

    # neg = self-contrast diagonal OR padded key column; local iotas compared
    # against scalars (cheaper than building global row/col index tiles).
    row_l = jax.lax.broadcasted_iota(jnp.int32, (tq, tk), 0)
    col_l = jax.lax.broadcasted_iota(jnp.int32, (tq, tk), 1)
    diag_off = qi * tq - ki * tk            # scalar
    pad_lo = actual_b - ki * tk             # scalar; local cols >= pad_lo are padding
    neg = jnp.logical_or(col_l - row_l == diag_off, col_l >= pad_lo)

    mask_pos = jnp.logical_and(overlap > 0, jnp.logical_not(neg))
    mask_f = mask_pos.astype(jnp.float32)

    # Running positive-pair statistics (no BxB p / p*log_q temporaries).
    sm_sc[...] += jnp.sum(mask_f, axis=-1, keepdims=True)
    sml_sc[...] += jnp.sum(jnp.where(mask_pos, logits, 0.0), axis=-1,
                           keepdims=True)

    # Online log-sum-exp over the masked logits.
    lm = jnp.where(neg, -1e9, logits)
    m_new = jnp.maximum(m_sc[...], jnp.max(lm, axis=-1, keepdims=True))
    l_sc[...] = l_sc[...] * jnp.exp(m_sc[...] - m_new) + jnp.sum(
        jnp.exp(lm - m_new), axis=-1, keepdims=True)
    m_sc[...] = m_new

    @pl.when(ki == pl.num_programs(1) - 1)
    def _():
        lse = m_sc[...] + jnp.log(l_sc[...])
        denom = jnp.maximum(sm_sc[...], 1.0)
        # sum_j p_ij * log_q_ij  =  (sml_i - lse_i * sm_i) / denom_i
        per_sample = (sml_sc[...] - lse * sm_sc[...]) / denom      # (tq, 1)
        # Lane-dense store: one (1, tq) row per q tile instead of (tq, 1)
        # lane-width-1 partial stores.
        out_ref[...] = jnp.transpose(per_sample)


def _vmem_bytes(tq, tk, d_pad, c_pad, lab_bytes):
    resident = tq * (2 * d_pad + lab_bytes * c_pad)         # Buffered(1) q side
    streamed = 2 * tk * (2 * d_pad + lab_bytes * c_pad)     # double-buffered kv side
    out_buf = 2 * tq * 4
    scratch = 4 * tq * 4
    temps = 8 * tq * tk * 4                                 # f32 (tq,tk) temporaries
    return resident + streamed + out_buf + scratch + temps


def multilabel_con_loss(feats, labels, temperature=0.1):
    """Pallas implementation of MultiLabelConLoss.forward (scalar loss)."""
    B, D = feats.shape
    _, C = labels.shape

    kind = _device_kind()
    is_v7 = "v7" in kind
    use_int8_labels = ("v5" in kind) or ("v6" in kind)   # int MXU only on v5/v6
    lab_dtype = jnp.int8 if use_int8_labels else jnp.bfloat16
    lab_bytes = 1 if use_int8_labels else 2

    d_pad = _round_up(D, 128)
    c_pad = _round_up(C, 128)
    b128 = _round_up(B, 128)

    # kv tile at the MXU-native width; q tile as large as VMEM allows so the
    # streamed kv side is re-read from HBM only b_pad/tq times.
    tk = min(256, b128)
    tq = min(1024, max(tk, (b128 // tk) * tk))
    if is_v7 and b128 >= 2 * tk:
        # Keep >= 2 q tiles so the "parallel" axis splits across both TCs.
        tq = min(tq, max(tk, (b128 // (2 * tk)) * tk))
    vmem_budget = (40 << 20) if is_v7 else (96 << 20)     # v7x: 64 MiB physical
    while tq > tk and _vmem_bytes(tq, tk, d_pad, c_pad, lab_bytes) > vmem_budget:
        tq -= tk
    # TODO(synk): for very large D or C, add a third "arbitrary" grid axis
    # chunking the contraction dim instead of full-width (tq, d/c) tiles.

    b_pad = _round_up(B, tq)                # tq % tk == 0  ->  b_pad % tk == 0
    n_q, n_k = b_pad // tq, b_pad // tk

    # Single bf16 feats buffer, passed for BOTH the q and kv streams (no
    # wrapper-side 1/temperature pre-scale, no duplicated feats array).
    f = jnp.pad(feats.astype(jnp.bfloat16), ((0, b_pad - B), (0, d_pad - D)))
    lab_q = jnp.pad(labels.astype(lab_dtype), ((0, b_pad - B), (0, c_pad - C)))
    lab_kT = lab_q.T                        # (c_pad, b_pad) for the NN overlap matmul

    kernel = functools.partial(
        _mlcl_kernel, actual_b=B, tq=tq, tk=tk,
        inv_t=float(1.0 / temperature), int_labels=use_int8_labels)

    bytes_per_row = 2 * d_pad + lab_bytes * c_pad
    cost = pl.CostEstimate(
        flops=2 * b_pad * b_pad * (d_pad + c_pad),
        transcendentals=b_pad * b_pad,
        bytes_accessed=(n_q + 1) * b_pad * bytes_per_row + n_q * tq * 4)
    vmem_limit = int(min(max(2 * _vmem_bytes(tq, tk, d_pad, c_pad, lab_bytes),
                             32 << 20),
                         (48 << 20) if is_v7 else (100 << 20)))

    per_sample = pl.pallas_call(
        kernel,
        out_shape=jax.ShapeDtypeStruct((n_q, tq), jnp.float32),
        grid_spec=pltpu.PrefetchScalarGridSpec(
            num_scalar_prefetch=0,
            grid=(n_q, n_k),
            in_specs=[
                # q-resident inputs: single buffer, only re-DMA'd when qi changes.
                pl.BlockSpec((tq, d_pad), lambda qi, ki: (qi, 0),
                             pipeline_mode=pl.Buffered(1)),
                # kv-streamed inputs: default double buffering.
                pl.BlockSpec((tk, d_pad), lambda qi, ki: (ki, 0)),
                pl.BlockSpec((tq, c_pad), lambda qi, ki: (qi, 0),
                             pipeline_mode=pl.Buffered(1)),
                pl.BlockSpec((c_pad, tk), lambda qi, ki: (0, ki)),
            ],
            out_specs=pl.BlockSpec((1, tq), lambda qi, ki: (qi, 0)),
            scratch_shapes=[pltpu.VMEM((tq, 1), jnp.float32)] * 4,  # m, l, sml, sm
        ),
        compiler_params=pltpu.CompilerParams(
            dimension_semantics=("parallel", "arbitrary"),
            vmem_limit_bytes=vmem_limit),
        cost_estimate=cost,
    )(f, f, lab_q, lab_kT)

    # Padded rows contribute exactly 0; mean is over the true batch size.
    return -(jnp.sum(per_sample) / B)


def _reference_loss(feats, labels, temperature=0.1):
    """Pure-JAX f32 reference mirroring the PyTorch module."""
    feats = feats.astype(jnp.float32)
    labels = labels.astype(jnp.float32)
    B = feats.shape[0]
    mask = (labels @ labels.T > 0.0).astype(jnp.float32)
    logits_mask = 1.0 - jnp.eye(B, dtype=jnp.float32)
    mask = mask * logits_mask
    logits = feats @ feats.T / temperature
    logits = logits - (1.0 - logits_mask) * 1e9
    logits = logits - jnp.max(logits, axis=-1, keepdims=True)
    log_q = logits - jnp.log(jnp.sum(jnp.exp(logits), axis=-1, keepdims=True))
    p = mask / jnp.maximum(jnp.sum(mask, axis=1, keepdims=True), 1.0)
    return -jnp.mean(jnp.sum(p * log_q, axis=-1))


if __name__ == "__main__":
    key = jax.random.PRNGKey(0)
    k_feats, k_labels = jax.random.split(key)

    batch = 8
    feature_dim = 32
    num_classes = 8
    temperature = 0.1

    feats = jax.random.normal(k_feats, (batch, feature_dim), dtype=jnp.float32)
    # L2-normalize features as is typical for contrastive losses.
    feats = feats / jnp.linalg.norm(feats, axis=-1, keepdims=True)
    labels = jax.random.bernoulli(
        k_labels, 0.5, (batch, num_classes)).astype(jnp.float32)

    loss = multilabel_con_loss(feats, labels, temperature)
    loss = jax.block_until_ready(loss)

    ref = _reference_loss(feats, labels, temperature)
    assert jnp.isfinite(loss), "loss is not finite"
    # Tolerance accounts for bf16 MXU operands (f32 accumulation / softmax math).
    assert jnp.allclose(loss, ref, rtol=3e-2, atol=3e-2), (loss, ref)

    print("KERNEL_OK")
</pallas_src>

<mosaic_0001>
module attributes {stable_mosaic.version = 11 : i64} {
  func.func @_mlcl_kernel(%arg0: i32, %arg1: i32, %arg2: memref<128x128xbf16, #tpu.memory_space<vmem>>, %arg3: memref<128x128xbf16, #tpu.memory_space<vmem>>, %arg4: memref<128x128xbf16, #tpu.memory_space<vmem>>, %arg5: memref<128x128xbf16, #tpu.memory_space<vmem>>, %arg6: memref<1x128xf32, #tpu.memory_space<vmem>>, %arg7: memref<128x1xf32, #tpu.memory_space<vmem>>, %arg8: memref<128x1xf32, #tpu.memory_space<vmem>>, %arg9: memref<128x1xf32, #tpu.memory_space<vmem>>, %arg10: memref<128x1xf32, #tpu.memory_space<vmem>>) attributes {dimension_semantics = [#tpu.dimension_semantics<parallel>, #tpu.dimension_semantics<arbitrary>], iteration_bounds = array<i64: 1, 1>, scalar_prefetch = 0 : i64, scratch_operands = 4 : i64, tpu.core_type = #tpu.core_type<tc>, window_params = [{pipeline_mode = #tpu.pipeline_mode<synchronous>, transform_indices = @transform_0, window_bounds = array<i64: 128, 128>}, {transform_indices = @transform_1, window_bounds = array<i64: 128, 128>}, {pipeline_mode = #tpu.pipeline_mode<synchronous>, transform_indices = @transform_2, window_bounds = array<i64: 128, 128>}, {transform_indices = @transform_3, window_bounds = array<i64: 128, 128>}, {transform_indices = @transform_4, window_bounds = array<i64: 1, 128>}]} {
    %c0_i32 = arith.constant 0 : i32
    %0 = arith.cmpi eq, %arg1, %c0_i32 : i32
    %1 = arith.extui %0 : i1 to i32
    %c0_i32_0 = arith.constant 0 : i32
    %2 = arith.cmpi ne, %1, %c0_i32_0 : i32
    scf.if %2 {
      %cst_40 = arith.constant 0xFF800000 : f32
      %64 = vector.broadcast %cst_40 : f32 to vector<128x1xf32>
      %c0_41 = arith.constant 0 : index
      %c0_42 = arith.constant 0 : index
      %65 = vector.load %arg7[%c0_41, %c0_42] : memref<128x1xf32, #tpu.memory_space<vmem>>, vector<128x1xf32>
      tpu.vector_store %arg7[%c0_41, %c0_42], %64 {strides = array<i32>} : memref<128x1xf32, #tpu.memory_space<vmem>>, vector<128x1xf32>,
      %cst_43 = arith.constant 0.000000e+00 : f32
      %66 = vector.broadcast %cst_43 : f32 to vector<128x1xf32>
      %c0_44 = arith.constant 0 : index
      %c0_45 = arith.constant 0 : index
      %67 = vector.load %arg8[%c0_44, %c0_45] : memref<128x1xf32, #tpu.memory_space<vmem>>, vector<128x1xf32>
      tpu.vector_store %arg8[%c0_44, %c0_45], %66 {strides = array<i32>} : memref<128x1xf32, #tpu.memory_space<vmem>>, vector<128x1xf32>,
      %cst_46 = arith.constant 0.000000e+00 : f32
      %68 = vector.broadcast %cst_46 : f32 to vector<128x1xf32>
      %c0_47 = arith.constant 0 : index
      %c0_48 = arith.constant 0 : index
      %69 = vector.load %arg9[%c0_47, %c0_48] : memref<128x1xf32, #tpu.memory_space<vmem>>, vector<128x1xf32>
      tpu.vector_store %arg9[%c0_47, %c0_48], %68 {strides = array<i32>} : memref<128x1xf32, #tpu.memory_space<vmem>>, vector<128x1xf32>,
      %cst_49 = arith.constant 0.000000e+00 : f32
      %70 = vector.broadcast %cst_49 : f32 to vector<128x1xf32>
      %c0_50 = arith.constant 0 : index
      %c0_51 = arith.constant 0 : index
      %71 = vector.load %arg10[%c0_50, %c0_51] : memref<128x1xf32, #tpu.memory_space<vmem>>, vector<128x1xf32>
      tpu.vector_store %arg10[%c0_50, %c0_51], %70 {strides = array<i32>} : memref<128x1xf32, #tpu.memory_space<vmem>>, vector<128x1xf32>,
    } else {
    }
    %c0 = arith.constant 0 : index
    %c0_1 = arith.constant 0 : index
    %3 = vector.load %arg2[%c0, %c0_1] : memref<128x128xbf16, #tpu.memory_space<vmem>>, vector<128x128xbf16>
    %c0_2 = arith.constant 0 : index
    %c0_3 = arith.constant 0 : index
    %4 = vector.load %arg3[%c0_2, %c0_3] : memref<128x128xbf16, #tpu.memory_space<vmem>>, vector<128x128xbf16>
    %cst = arith.constant dense<0.000000e+00> : vector<128x128xf32>
    %5 = tpu.matmul %3, %4, %cst {dimension_numbers = #tpu.dot_dimension_numbers<[1], [1], [0], [0], [0, 0, 1, 0], [], []>} : vector<128x128xbf16>, vector<128x128xbf16>, vector<128x128xf32> -> vector<128x128xf32>
    %cst_4 = arith.constant 1.000000e+01 : f32
    %6 = vector.broadcast %cst_4 : f32 to vector<128x128xf32>
    %7 = arith.mulf %5, %6 : vector<128x128xf32>
    %c0_5 = arith.constant 0 : index
    %c0_6 = arith.constant 0 : index
    %8 = vector.load %arg4[%c0_5, %c0_6] : memref<128x128xbf16, #tpu.memory_space<vmem>>, vector<128x128xbf16>
    %c0_7 = arith.constant 0 : index
    %c0_8 = arith.constant 0 : index
    %9 = vector.load %arg5[%c0_7, %c0_8] : memref<128x128xbf16, #tpu.memory_space<vmem>>, vector<128x128xbf16>
    %cst_9 = arith.constant dense<0.000000e+00> : vector<128x128xf32>
    %10 = tpu.matmul %8, %9, %cst_9 {dimension_numbers = #tpu.dot_dimension_numbers<[1], [0], [0], [1], [0, 0, 1, 1], [], []>} : vector<128x128xbf16>, vector<128x128xbf16>, vector<128x128xf32> -> vector<128x128xf32>
    %11 = tpu.iota {dimensions = array<i32: 0>} : vector<128x128xi32>
    %12 = tpu.iota {dimensions = array<i32: 1>} : vector<128x128xi32>
    %c128_i32 = arith.constant 128 : i32
    %13 = arith.muli %arg0, %c128_i32 : i32
    %c128_i32_10 = arith.constant 128 : i32
    %14 = arith.muli %arg1, %c128_i32_10 : i32
    %15 = arith.subi %13, %14 : i32
    %c128_i32_11 = arith.constant 128 : i32
    %16 = arith.muli %arg1, %c128_i32_11 : i32
    %c8_i32 = arith.constant 8 : i32
    %17 = arith.subi %c8_i32, %16 : i32
    %18 = arith.subi %12, %11 : vector<128x128xi32>
    %19 = vector.broadcast %15 : i32 to vector<128x128xi32>
    %20 = arith.cmpi eq, %18, %19 : vector<128x128xi32>
    %21 = vector.broadcast %17 : i32 to vector<128x128xi32>
    %22 = arith.cmpi sge, %12, %21 : vector<128x128xi32>
    %23 = arith.ori %20, %22 : vector<128x128xi1>
    %cst_12 = arith.constant 0.000000e+00 : f32
    %24 = vector.broadcast %cst_12 : f32 to vector<128x128xf32>
    %25 = arith.cmpf ogt, %10, %24 : vector<128x128xf32>
    %cst_13 = arith.constant dense<true> : vector<128x128xi1>
    %26 = arith.xori %23, %cst_13 : vector<128x128xi1>
    %27 = arith.andi %25, %26 : vector<128x128xi1>
    %28 = arith.extui %27 : vector<128x128xi1> to vector<128x128xi32>
    %29 = arith.sitofp %28 : vector<128x128xi32> to vector<128x128xf32>
    %c0_14 = arith.constant 0 : index
    %c0_15 = arith.constant 0 : index
    %30 = vector.load %arg10[%c0_14, %c0_15] : memref<128x1xf32, #tpu.memory_space<vmem>>, vector<128x1xf32>
    %cst_16 = arith.constant dense<0.000000e+00> : vector<128xf32>
    %31 = vector.multi_reduction <add>, %29, %cst_16 [1] : vector<128x128xf32> to vector<128xf32>
    %32 = vector.shape_cast %31 : vector<128xf32> to vector<128x1xf32>
    %33 = arith.addf %30, %32 : vector<128x1xf32>
    %c0_17 = arith.constant 0 : index
    %c0_18 = arith.constant 0 : index
    %34 = vector.load %arg10[%c0_17, %c0_18] : memref<128x1xf32, #tpu.memory_space<vmem>>, vector<128x1xf32>
    tpu.vector_store %arg10[%c0_17, %c0_18], %33 {strides = array<i32>} : memref<128x1xf32, #tpu.memory_space<vmem>>, vector<128x1xf32>,
    %c0_19 = arith.constant 0 : index
    %c0_20 = arith.constant 0 : index
    %35 = vector.load %arg9[%c0_19, %c0_20] : memref<128x1xf32, #tpu.memory_space<vmem>>, vector<128x1xf32>
    %cst_21 = arith.constant 0.000000e+00 : f32
    %36 = vector.broadcast %cst_21 : f32 to vector<128x128xf32>
    %37 = arith.select %27, %7, %36 : vector<128x128xi1>, vector<128x128xf32>
    %cst_22 = arith.constant dense<0.000000e+00> : vector<128xf32>
    %38 = vector.multi_reduction <add>, %37, %cst_22 [1] : vector<128x128xf32> to vector<128xf32>
    %39 = vector.shape_cast %38 : vector<128xf32> to vector<128x1xf32>
    %40 = arith.addf %35, %39 : vector<128x1xf32>
    %c0_23 = arith.constant 0 : index
    %c0_24 = arith.constant 0 : index
    %41 = vector.load %arg9[%c0_23, %c0_24] : memref<128x1xf32, #tpu.memory_space<vmem>>, vector<128x1xf32>
    tpu.vector_store %arg9[%c0_23, %c0_24], %40 {strides = array<i32>} : memref<128x1xf32, #tpu.memory_space<vmem>>, vector<128x1xf32>,
    %cst_25 = arith.constant -1.000000e+09 : f32
    %42 = vector.broadcast %cst_25 : f32 to vector<128x128xf32>
    %43 = arith.select %23, %42, %7 : vector<128x128xi1>, vector<128x128xf32>
    %c0_26 = arith.constant 0 : index
    %c0_27 = arith.constant 0 : index
    %44 = vector.load %arg7[%c0_26, %c0_27] : memref<128x1xf32, #tpu.memory_space<vmem>>, vector<128x1xf32>
    %cst_28 = arith.constant dense<0xFF800000> : vector<128xf32>
    %45 = vector.multi_reduction <maximumf>, %43, %cst_28 [1] : vector<128x128xf32> to vector<128xf32>
    %46 = vector.shape_cast %45 : vector<128xf32> to vector<128x1xf32>
    %47 = arith.maximumf %44, %46 : vector<128x1xf32>
    %c0_29 = arith.constant 0 : index
    %c0_30 = arith.constant 0 : index
    %48 = vector.load %arg8[%c0_29, %c0_30] : memref<128x1xf32, #tpu.memory_space<vmem>>, vector<128x1xf32>
    %c0_31 = arith.constant 0 : index
    %c0_32 = arith.constant 0 : index
    %49 = vector.load %arg7[%c0_31, %c0_32] : memref<128x1xf32, #tpu.memory_space<vmem>>, vector<128x1xf32>
    %50 = arith.subf %49, %47 : vector<128x1xf32>
    %51 = math.exp %50 : vector<128x1xf32>
    %52 = arith.mulf %48, %51 : vector<128x1xf32>
    %53 = vector.broadcast %47 : vector<128x1xf32> to vector<128x128xf32>
    %54 = arith.subf %43, %53 : vector<128x128xf32>
    %55 = math.exp %54 : vector<128x128xf32>
    %cst_33 = arith.constant dense<0.000000e+00> : vector<128xf32>
    %56 = vector.multi_reduction <add>, %55, %cst_33 [1] : vector<128x128xf32> to vector<128xf32>
    %57 = vector.shape_cast %56 : vector<128xf32> to vector<128x1xf32>
    %58 = arith.addf %52, %57 : vector<128x1xf32>
    %c0_34 = arith.constant 0 : index
    %c0_35 = arith.constant 0 : index
    %59 = vector.load %arg8[%c0_34, %c0_35] : memref<128x1xf32, #tpu.memory_space<vmem>>, vector<128x1xf32>
    tpu.vector_store %arg8[%c0_34, %c0_35], %58 {strides = array<i32>} : memref<128x1xf32, #tpu.memory_space<vmem>>, vector<128x1xf32>,
    %c0_36 = arith.constant 0 : index
    %c0_37 = arith.constant 0 : index
    %60 = vector.load %arg7[%c0_36, %c0_37] : memref<128x1xf32, #tpu.memory_space<vmem>>, vector<128x1xf32>
    tpu.vector_store %arg7[%c0_36, %c0_37], %47 {strides = array<i32>} : memref<128x1xf32, #tpu.memory_space<vmem>>, vector<128x1xf32>,
    %c0_i32_38 = arith.constant 0 : i32
    %61 = arith.cmpi eq, %arg1, %c0_i32_38 : i32
    %62 = arith.extui %61 : i1 to i32
    %c0_i32_39 = arith.constant 0 : i32
    %63 = arith.cmpi ne, %62, %c0_i32_39 : i32
    scf.if %63 {
      %c0_40 = arith.constant 0 : index
      %c0_41 = arith.constant 0 : index
      %64 = vector.load %arg7[%c0_40, %c0_41] : memref<128x1xf32, #tpu.memory_space<vmem>>, vector<128x1xf32>
      %c0_42 = arith.constant 0 : index
      %c0_43 = arith.constant 0 : index
      %65 = vector.load %arg8[%c0_42, %c0_43] : memref<128x1xf32, #tpu.memory_space<vmem>>, vector<128x1xf32>
      %66 = math.log %65 : vector<128x1xf32>
      %67 = arith.addf %64, %66 : vector<128x1xf32>
      %c0_44 = arith.constant 0 : index
      %c0_45 = arith.constant 0 : index
      %68 = vector.load %arg10[%c0_44, %c0_45] : memref<128x1xf32, #tpu.memory_space<vmem>>, vector<128x1xf32>
      %cst_46 = arith.constant 1.000000e+00 : f32
      %69 = vector.broadcast %cst_46 : f32 to vector<128x1xf32>
      %70 = arith.maximumf %68, %69 : vector<128x1xf32>
      %c0_47 = arith.constant 0 : index
      %c0_48 = arith.constant 0 : index
      %71 = vector.load %arg9[%c0_47, %c0_48] : memref<128x1xf32, #tpu.memory_space<vmem>>, vector<128x1xf32>
      %c0_49 = arith.constant 0 : index
      %c0_50 = arith.constant 0 : index
      %72 = vector.load %arg10[%c0_49, %c0_50] : memref<128x1xf32, #tpu.memory_space<vmem>>, vector<128x1xf32>
      %73 = arith.mulf %67, %72 : vector<128x1xf32>
      %74 = arith.subf %71, %73 : vector<128x1xf32>
      %75 = arith.divf %74, %70 : vector<128x1xf32>
      %76 = tpu.transpose %75, [1, 0] : vector<128x1xf32> -> vector<1x128xf32>
      %c0_51 = arith.constant 0 : index
      %c0_52 = arith.constant 0 : index
      %77 = vector.load %arg6[%c0_51, %c0_52] : memref<1x128xf32, #tpu.memory_space<vmem>>, vector<1x128xf32>
      tpu.vector_store %arg6[%c0_51, %c0_52], %76 {strides = array<i32>} : memref<1x128xf32, #tpu.memory_space<vmem>>, vector<1x128xf32>,
    } else {
    }
    return
  }
  func.func @transform_0(%arg0: i32, %arg1: i32) -> (i32, i32) {
    %c0_i32 = arith.constant 0 : i32
    %c0_i32_0 = arith.constant 0 : i32
    return %arg0, %c0_i32 : i32, i32
  }
  func.func @transform_1(%arg0: i32, %arg1: i32) -> (i32, i32) {
    %c0_i32 = arith.constant 0 : i32
    %c0_i32_0 = arith.constant 0 : i32
    return %arg1, %c0_i32 : i32, i32
  }
  func.func @transform_2(%arg0: i32, %arg1: i32) -> (i32, i32) {
    %c0_i32 = arith.constant 0 : i32
    %c0_i32_0 = arith.constant 0 : i32
    return %arg0, %c0_i32 : i32, i32
  }
  func.func @transform_3(%arg0: i32, %arg1: i32) -> (i32, i32) {
    %c0_i32 = arith.constant 0 : i32
    %c0_i32_0 = arith.constant 0 : i32
    return %c0_i32, %arg1 : i32, i32
  }
  func.func @transform_4(%arg0: i32, %arg1: i32) -> (i32, i32) {
    %c0_i32 = arith.constant 0 : i32
    %c0_i32_0 = arith.constant 0 : i32
    return %arg0, %c0_i32 : i32, i32
  }
}

</mosaic_0001>

<bundles_post_ra>
// kernel: tpu_custom_call.1
= control target key start
LH: loop header
LB: loop body
LE: loop exit
PB: predicated region body
PF: predicated region fallthrough
CT: control target
= control target key end

     0   :  { %9 = vsyncpa [#allocation7], 0  ;;  %s3218_s0 = inlined_call_operand.hbm [shape: bf16[128,128], index: 0, kind: input, shape index: {}]   ;;  %s3219_s1 = inlined_call_operand.hbm [shape: bf16[128,128], index: 1, kind: input, shape index: {}]   ;;  %s3220_s2 = inlined_call_operand.hbm [shape: bf16[128,128], index: 2, kind: input, shape index: {}]   ;;  %s3221_s3 = inlined_call_operand.hbm [shape: bf16[128,128], index: 3, kind: input, shape index: {}]   ;;  %s3222_s4 = inlined_call_operand.hbm [shape: f32[1,128], index: 4, kind: output, shape index: {}]  }
   0x1   :  { %10 = vsyncpa [#allocation10], 0 }
   0x2   :  { %11 = vsyncpa [#allocation13], 0 }
   0x3   :  { %12 = vsyncpa [#allocation8], 0  ;;  %s1988_s15 = smov [#allocation9]   ;;  %s1989_s17 = smov [#allocation6]  }
   0x4   :  { %s30_s16 = sshll.u32 %s1988_s15, 4  ;;  %s18_s18 = sshll.u32 %s1989_s17, 4  ;;  %s31_s16 = int_to_ptr.vmem [resolvable:$true] %s30_s16  ;;  %s2024_s18 = int_to_ptr.vmem [resolvable:$true] %s18_s18 }
   0x5   :  { %s1870_s21 = scalar_lea.hbm %s3219_s1, 1024 }
   0x6   :  { %p1871_p0 = scmp.ne.s32.totalorder %s3219_s1, %s1870_s21  ;;  %p1874_p1 = scmp.lt.u32.totalorder %s1870_s21, %s3219_s1 }
   0x8   :  { %p1876_p2 = pnand %p1874_p1, %p1871_p0 }
   0xa   :  { %1879 = shalt.err (!%p1876_p2)
}
   0xb   :  { %s1880_s26 = scalar_lea.vmem %s31_s16, 1024  ;;  %p1885_p4 = scmp.lt.s32.totalorder %s31_s16, %s31_s16 }
   0xc   :  { %p1881_p3 = scmp.ne.s32.totalorder %s31_s16, %s1880_s26  ;;  %p1886_p5 = scmp.lt.s32.totalorder %s1880_s26, %s1880_s26 }
   0xe   :  { %p1887_p6 = por %p1886_p5, %p1885_p4 }
  0x10   :  { %p1888_p7 = pnand %p1887_p6, %p1881_p3 }
  0x12   :  { %1891 = shalt.err (!%p1888_p7)
}
  0x13   :  { %s1990_s27 = smov 64   ;;  %s1991_s28 = smov 4  }
  0x14   :  { %36 = dma.hbm_to_vmem [thread:$0]  %s3219_s1, 1024, %s31_s16, [#allocation10], %s1990_s27, %s1990_s27, %s1991_s28  }
  0x15   :  { %s1892_s7 = scalar_lea.hbm %s3218_s0, 1024 }
  0x16   :  { %p1893_p8 = scmp.ne.s32.totalorder %s3218_s0, %s1892_s7  ;;  %p1896_p9 = scmp.lt.u32.totalorder %s1892_s7, %s3218_s0 }
  0x18   :  { %p1898_p10 = pnand %p1896_p9, %p1893_p8 }
  0x1a   :  { %1901 = shalt.err (!%p1898_p10)
}
  0x1b   :  { %s1902_s12 = scalar_lea.vmem %s2024_s18, 1024  ;;  %p1907_p12 = scmp.lt.s32.totalorder %s2024_s18, %s2024_s18 }
  0x1c   :  { %p1903_p11 = scmp.ne.s32.totalorder %s2024_s18, %s1902_s12  ;;  %p1908_p13 = scmp.lt.s32.totalorder %s1902_s12, %s1902_s12 }
  0x1e   :  { %p1909_p0 = por %p1908_p13, %p1907_p12 }
  0x20   :  { %p1910_p1 = pnand %p1909_p0, %p1903_p11 }
  0x22   :  { %1913 = shalt.err (!%p1910_p1)
}
  0x23   :  { %24 = dma.hbm_to_vmem [thread:$0]  %s3218_s0, 1024, %s2024_s18, [#allocation7], %s1990_s27, %s1990_s27, %s1991_s28  }
  0x24   :  { %s1992_s14 = smov [#allocation11]   ;;  %s1993_s16 = smov [#allocation12]  }
  0x25   :  { %s42_s15 = sshll.u32 %s1992_s14, 4  ;;  %s54_s17 = sshll.u32 %s1993_s16, 4  ;;  %s43_s15 = int_to_ptr.vmem [resolvable:$true] %s42_s15  ;;  %s2061_s17 = int_to_ptr.vmem [resolvable:$true] %s54_s17 }
  0x26   :  { %s1914_s21 = scalar_lea.hbm %s3220_s2, 1024 }
  0x27   :  { %p1915_p2 = scmp.ne.s32.totalorder %s3220_s2, %s1914_s21  ;;  %p1918_p3 = scmp.lt.u32.totalorder %s1914_s21, %s3220_s2 }
  0x29   :  { %p1920_p4 = pnand %p1918_p3, %p1915_p2 }
  0x2b   :  { %1923 = shalt.err (!%p1920_p4)
}
  0x2c   :  { %s1924_s0 = scalar_lea.vmem %s43_s15, 1024  ;;  %p1929_p6 = scmp.lt.s32.totalorder %s43_s15, %s43_s15 }
  0x2d   :  { %p1925_p5 = scmp.ne.s32.totalorder %s43_s15, %s1924_s0  ;;  %p1930_p7 = scmp.lt.s32.totalorder %s1924_s0, %s1924_s0 }
  0x2f   :  { %p1931_p8 = por %p1930_p7, %p1929_p6 }
  0x31   :  { %p1932_p9 = pnand %p1931_p8, %p1925_p5 }
  0x33   :  { %1935 = shalt.err (!%p1932_p9)
}
  0x34   :  { %48 = dma.hbm_to_vmem [thread:$0]  %s3220_s2, 1024, %s43_s15, [#allocation10], %s1990_s27, %s1990_s27, %s1991_s28  }
  0x35   :  { %s1936_s5 = scalar_lea.hbm %s3221_s3, 1024 }
  0x36   :  { %p1937_p10 = scmp.ne.s32.totalorder %s3221_s3, %s1936_s5  ;;  %p1940_p11 = scmp.lt.u32.totalorder %s1936_s5, %s3221_s3 }
  0x38   :  { %p1942_p12 = pnand %p1940_p11, %p1937_p10 }
  0x3a   :  { %1945 = shalt.err (!%p1942_p12)
}
  0x3b   :  { %s1946_s10 = scalar_lea.vmem %s2061_s17, 1024  ;;  %p1951_p0 = scmp.lt.s32.totalorder %s2061_s17, %s2061_s17 }
  0x3c   :  { %p1947_p13 = scmp.ne.s32.totalorder %s2061_s17, %s1946_s10  ;;  %p1952_p1 = scmp.lt.s32.totalorder %s1946_s10, %s1946_s10 }
  0x3e   :  { %p1953_p2 = por %p1952_p1, %p1951_p0 }
  0x40   :  { %p1954_p3 = pnand %p1953_p2, %p1947_p13 }
  0x42   :  { %1957 = shalt.err (!%p1954_p3)
}
  0x43   :  { %60 = dma.hbm_to_vmem [thread:$0]  %s3221_s3, 1024, %s2061_s17, [#allocation13], %s1990_s27, %s1990_s27, %s1991_s28  }
  0x44   :  { %1980 = dma.done.wait [#allocation7], 1024  }
  0x45   :  { %1981 = vsyncadd [#allocation7], 4294966272 }
  0x46   :  { %1982 = dma.done.wait [#allocation10], 2048  }
  0x47   :  { %1983 = vsyncadd [#allocation10], 4294965248 }
  0x48   :  { %1984 = dma.done.wait [#allocation13], 1024  }
  0x49   :  { %1985 = vsyncadd [#allocation13], 4294966272  ;;  %v1710_v0 = vld [vmem:[#allocation9] sm:$0xff]   ;;  %v1711_v1 = vld [vmem:[#allocation9 + $0x8] sm:$0xff]   ;;  %vm3223_vm0 = vcmask 7168   ;;  %v3258_v32 = vmov 0.0   ;;  %v609_v33 = vlaneseq }
  0x4a   :  { %1633 = vmatprep.subr.bf16.mxu0 %v1710_v0  ;;  %v1714_v2 = vld [vmem:[#allocation12] sm:$0xff]   ;;  %v1715_v3 = vld [vmem:[#allocation12 + $0x8] sm:$0xff]   ;;  %v1712_v4 = vld [vmem:[#allocation9 + $0x10] sm:$0xff]   ;;  %127 = vst.msk [vmem:[#allocation5] sm:$0xff] %vm3223_vm0, %v3258_v32  ;;  %vm3224_vm4 = vmmov 1   ;;  %v3288_v42 = vmov 0 }
  0x4b   :  { %1634 = vmatpush3.bf16.xpose.msra.mxu0 %v1710_v0  ;;  %1665 = vmatprep.subr.bf16.mxu1 %v1714_v2  ;;  %v1717_v5 = vld [vmem:[#allocation12 + $0x10] sm:$0xff]   ;;  %v1718_v6 = vld [vmem:[#allocation12 + $0x18] sm:$0xff]   ;;  %v1725_v8 = vld [vmem:[#allocation11] sm:$0xff]   ;;  %95 = vst.msk [vmem:[#allocation3] sm:$0xff] %vm3223_vm0, %v3258_v32  ;;  %v2194_v34 = vand.u32 127, %v609_v33  ;;  %v2196_v35 = vshrl.u32 %v609_v33, 7 }
  0x4c   :  { %1635 = vmatprep.subr.bf16.mxu0 %v1711_v1  ;;  %1666 = vmatpush3.bf16.msra.mxu1 %v1714_v2  ;;  %v1713_v7 = vld [vmem:[#allocation9 + $0x18] sm:$0xff]   ;;  %v1720_v9 = vld [vmem:[#allocation12 + $0x20] sm:$0xff]   ;;  %v1721_v11 = vld [vmem:[#allocation12 + $0x28] sm:$0xff]   ;;  %96 = vst.msk [vmem:[#allocation3 + $0x8] sm:$0xff] %vm3223_vm0, %v3258_v32  ;;  %v3290_v61 = vmov 0  ;;  %v3292_v2 = vmov 0 }
  0x4d   :  { %1667 = vmatprep.subr.bf16.mxu1 %v1715_v3  ;;  %1681 = vmatprep.mubr.bf16.mxu1 %v1725_v8  ;;  %v1728_v10 = vld [vmem:[#allocation6] sm:$0xff]   ;;  %v1723_v13 = vld [vmem:[#allocation12 + $0x30] sm:$0xff]   ;;  %v1724_v14 = vld [vmem:[#allocation12 + $0x38] sm:$0xff]   ;;  %97 = vst.msk [vmem:[#allocation3 + $0x10] sm:$0xff] %vm3223_vm0, %v3258_v32  ;;  %v632_v36 = vsub.s32 %v2194_v34, %v2196_v35  ;;  %vm3228_vm2 = vcmp.ge.s32.totalorder %v2194_v34, 8  ;;  %v613_v44 = vadd.s32 24, %v2196_v35 }
  0x4e   :  { %1649 = vmatprep.mubr.bf16.mxu0 %v1728_v10  ;;  %v1716_v12 = vld [vmem:[#allocation9 + $0x20] sm:$0xff]   ;;  %v1719_v15 = vld [vmem:[#allocation9 + $0x28] sm:$0xff]   ;;  %v1734_v17 = vld [vmem:[#allocation11 + $0x10] sm:$0xff]   ;;  %98 = vst.msk [vmem:[#allocation3 + $0x18] sm:$0xff] %vm3223_vm0, %v3258_v32  ;;  %v611_v45 = vadd.s32 8, %v2196_v35  ;;  %v612_v47 = vadd.s32 16, %v2196_v35 }
  0x4f   :  { %v1727_v16 = vld [vmem:[#allocation11 + $0x8] sm:$0xff]   ;;  %v1722_v18 = vld [vmem:[#allocation9 + $0x30] sm:$0xff]   ;;  %v1735_v19 = vld [vmem:[#allocation11 + $0x18] sm:$0xff]   ;;  %99 = vst.msk [vmem:[#allocation3 + $0x20] sm:$0xff] %vm3223_vm0, %v3258_v32  ;;  %vm649_vm1 = vcmp.eq.s32.totalorder %v632_v36, 0  ;;  %v635_v50 = vsub.s32 %v2194_v34, %v613_v44  ;;  %v616_v54 = vadd.s32 48, %v2196_v35 }
  0x50   :  { %1668 = vmatpush3.bf16.msra.mxu1 %v1715_v3  ;;  %v1738_v20 = vld [vmem:[#allocation11 + $0x20] sm:$0xff]   ;;  %v1726_v21 = vld [vmem:[#allocation9 + $0x38] sm:$0xff]   ;;  %v1739_v22 = vld [vmem:[#allocation11 + $0x28] sm:$0xff]   ;;  %100 = vst.msk [vmem:[#allocation3 + $0x28] sm:$0xff] %vm3223_vm0, %v3258_v32  ;;  %v633_v52 = vsub.s32 %v2194_v34, %v611_v45  ;;  %v634_v53 = vsub.s32 %v2194_v34, %v612_v47  ;;  %v617_v55 = vadd.s32 56, %v2196_v35  ;;  %v614_v56 = vadd.s32 32, %v2196_v35 }
  0x51   :  { %1669 = vmatprep.subr.bf16.mxu1 %v1717_v5  ;;  %v1740_v23 = vld [vmem:[#allocation11 + $0x30] sm:$0xff]   ;;  %v1741_v24 = vld [vmem:[#allocation11 + $0x38] sm:$0xff]   ;;  %v1729_v25 = vld [vmem:[#allocation6 + $0x8] sm:$0xff]   ;;  %101 = vst.msk [vmem:[#allocation3 + $0x30] sm:$0xff] %vm3223_vm0, %v3258_v32  ;;  %vm652_vm8 = vcmp.eq.s32.totalorder %v635_v50, 0  ;;  %v615_v57 = vadd.s32 40, %v2196_v35  ;;  %v638_v59 = vsub.s32 %v2194_v34, %v616_v54 }
  0x52   :  { %v1730_v26 = vld [vmem:[#allocation6 + $0x10] sm:$0xff]   ;;  %v1731_v27 = vld [vmem:[#allocation6 + $0x18] sm:$0xff]   ;;  %v1732_v28 = vld [vmem:[#allocation6 + $0x20] sm:$0xff]   ;;  %102 = vst.msk [vmem:[#allocation3 + $0x38] sm:$0xff] %vm3223_vm0, %v3258_v32  ;;  %vm650_vm9 = vcmp.eq.s32.totalorder %v633_v52, 0  ;;  %vm651_vm10 = vcmp.eq.s32.totalorder %v634_v53, 0  ;;  %v639_v62 = vsub.s32 %v2194_v34, %v617_v55  ;;  %v636_v63 = vsub.s32 %v2194_v34, %v614_v56 }
  0x53   :  { %1636 = vmatpush3.bf16.xpose.msra.mxu0 %v1711_v1  ;;  %v1733_v29 = vld [vmem:[#allocation6 + $0x28] sm:$0xff]   ;;  %v1736_v30 = vld [vmem:[#allocation6 + $0x30] sm:$0xff]   ;;  %v1737_v31 = vld [vmem:[#allocation6 + $0x38] sm:$0xff]   ;;  %103 = vst.msk [vmem:[#allocation3 + $0x40] sm:$0xff] %vm3223_vm0, %v3258_v32  ;;  %v618_v0 = vadd.s32 64, %v2196_v35  ;;  %v637_v3 = vsub.s32 %v2194_v34, %v615_v57  ;;  %vm2274_vm14 = vcmp.eq.s32.totalorder %v638_v59, 0 }
  0x54   :  { %1637 = vmatprep.subr.bf16.mxu0 %v1712_v4  ;;  %1670 = vmatpush3.bf16.msra.mxu1 %v1717_v5  ;;  %104 = vst.msk [vmem:[#allocation3 + $0x48] sm:$0xff] %vm3223_vm0, %v3258_v32  ;;  %105 = vst.msk [vmem:[#allocation3 + $0x50] sm:$0xff] %vm3223_vm0, %v3258_v32  ;;  %vm2278_vm15 = vcmp.eq.s32.totalorder %v639_v62, 0  ;;  %v3323_v33 = vmov 0  ;;  %v624_v44 = vadd.s32 112, %v2196_v35  ;;  %v623_v45 = vadd.s32 104, %v2196_v35 }
  0x55   :  { %1671 = vmatprep.subr.bf16.mxu1 %v1718_v6  ;;  %106 = vst.msk [vmem:[#allocation3 + $0x58] sm:$0xff] %vm3223_vm0, %v3258_v32  ;;  %107 = vst.msk [vmem:[#allocation3 + $0x60] sm:$0xff] %vm3223_vm0, %v3258_v32  ;;  %v622_v53 = vadd.s32 96, %v2196_v35  ;;  %v3331_v54 = vmov 0  ;;  %v625_v59 = vadd.s32 120, %v2196_v35  ;;  %v3341_v5 = vmov 0 }
  0x56   :  { %108 = vst.msk [vmem:[#allocation3 + $0x68] sm:$0xff] %vm3223_vm0, %v3258_v32  ;;  %109 = vst.msk [vmem:[#allocation3 + $0x70] sm:$0xff] %vm3223_vm0, %v3258_v32  ;;  %v3394_v62 = vmov 0  ;;  %s1998_s3 = smov [#allocation14]  }
  0x57   :  { %110 = vst.msk [vmem:[#allocation3 + $0x78] sm:$0xff] %vm3223_vm0, %v3258_v32  ;;  %111 = vst.msk [vmem:[#allocation4] sm:$0xff] %vm3223_vm0, %v3258_v32  ;;  %s1542_s27 = sshll.u32 %s1998_s3, 4  ;;  %s1543_s27 = int_to_ptr.vmem [resolvable:$true] %s1542_s27 }
  0x58   :  { %1672 = vmatpush3.bf16.msra.mxu1 %v1718_v6  ;;  %112 = vst.msk [vmem:[#allocation4 + $0x8] sm:$0xff] %vm3223_vm0, %v3258_v32  ;;  %113 = vst.msk [vmem:[#allocation4 + $0x10] sm:$0xff] %vm3223_vm0, %v3258_v32  ;;  %v620_v6 = vadd.s32 80, %v2196_v35  ;;  %s1958_s28 = scalar_lea.vmem %s1543_s27, 16  ;;  %s1962_s12 = scalar_lea.vmem %s1543_s27, 32 }
  0x59   :  { %1673 = vmatprep.subr.bf16.mxu1 %v1720_v9  ;;  %114 = vst.msk [vmem:[#allocation4 + $0x18] sm:$0xff] %vm3223_vm0, %v3258_v32  ;;  %115 = vst.msk [vmem:[#allocation4 + $0x20] sm:$0xff] %vm3223_vm0, %v3258_v32  ;;  %p1959_p4 = scmp.ne.s32.totalorder %s1543_s27, %s1958_s28  ;;  %p1963_p5 = scmp.lt.s32.totalorder %s1543_s27, %s1543_s27 }
  0x5a   :  { %116 = vst.msk [vmem:[#allocation4 + $0x28] sm:$0xff] %vm3223_vm0, %v3258_v32  ;;  %117 = vst.msk [vmem:[#allocation4 + $0x30] sm:$0xff] %vm3223_vm0, %v3258_v32  ;;  %p1964_p6 = scmp.lt.s32.totalorder %s1962_s12, %s1958_s28 }
  0x5b   :  { %1638 = vmatpush3.bf16.xpose.msra.mxu0 %v1712_v4  ;;  %118 = vst.msk [vmem:[#allocation4 + $0x38] sm:$0xff] %vm3223_vm0, %v3258_v32  ;;  %119 = vst.msk [vmem:[#allocation4 + $0x40] sm:$0xff] %vm3223_vm0, %v3258_v32 }
  0x5c   :  { %1639 = vmatprep.subr.bf16.mxu0 %v1713_v7  ;;  %1674 = vmatpush3.bf16.msra.mxu1 %v1720_v9  ;;  %120 = vst.msk [vmem:[#allocation4 + $0x48] sm:$0xff] %vm3223_vm0, %v3258_v32  ;;  %121 = vst.msk [vmem:[#allocation4 + $0x50] sm:$0xff] %vm3223_vm0, %v3258_v32  ;;  %v3346_v9 = vmov 0  ;;  %p1965_p7 = por %p1964_p6, %p1963_p5 }
  0x5d   :  { %1675 = vmatprep.subr.bf16.mxu1 %v1721_v11  ;;  %122 = vst.msk [vmem:[#allocation4 + $0x58] sm:$0xff] %vm3223_vm0, %v3258_v32  ;;  %123 = vst.msk [vmem:[#allocation4 + $0x60] sm:$0xff] %vm3223_vm0, %v3258_v32 }
  0x5e   :  { %124 = vst.msk [vmem:[#allocation4 + $0x68] sm:$0xff] %vm3223_vm0, %v3258_v32  ;;  %125 = vst.msk [vmem:[#allocation4 + $0x70] sm:$0xff] %vm3223_vm0, %v3258_v32  ;;  %p1966_p8 = pnand %p1965_p7, %p1959_p4 }
  0x5f   :  { %126 = vst.msk [vmem:[#allocation4 + $0x78] sm:$0xff] %vm3223_vm0, %v3258_v32  ;;  %128 = vst.msk [vmem:[#allocation5 + $0x8] sm:$0xff] %vm3223_vm0, %v3258_v32 }
  0x60   :  { %1676 = vmatpush3.bf16.msra.mxu1 %v1721_v11  ;;  %129 = vst.msk [vmem:[#allocation5 + $0x10] sm:$0xff] %vm3223_vm0, %v3258_v32  ;;  %130 = vst.msk [vmem:[#allocation5 + $0x18] sm:$0xff] %vm3223_vm0, %v3258_v32  ;;  %v640_v11 = vsub.s32 %v2194_v34, %v618_v0 }
  0x61   :  { %1677 = vmatprep.subr.bf16.mxu1 %v1723_v13  ;;  %131 = vst.msk [vmem:[#allocation5 + $0x20] sm:$0xff] %vm3223_vm0, %v3258_v32  ;;  %132 = vst.msk [vmem:[#allocation5 + $0x28] sm:$0xff] %vm3223_vm0, %v3258_v32 }
  0x62   :  { %133 = vst.msk [vmem:[#allocation5 + $0x30] sm:$0xff] %vm3223_vm0, %v3258_v32  ;;  %134 = vst.msk [vmem:[#allocation5 + $0x38] sm:$0xff] %vm3223_vm0, %v3258_v32 }
  0x63   :  { %1640 = vmatpush3.bf16.xpose.msra.mxu0 %v1713_v7  ;;  %135 = vst.msk [vmem:[#allocation5 + $0x40] sm:$0xff] %vm3223_vm0, %v3258_v32  ;;  %136 = vst.msk [vmem:[#allocation5 + $0x48] sm:$0xff] %vm3223_vm0, %v3258_v32  ;;  %v621_v7 = vadd.s32 88, %v2196_v35 }
  0x64   :  { %1641 = vmatprep.subr.bf16.mxu0 %v1716_v12  ;;  %1678 = vmatpush3.bf16.msra.mxu1 %v1723_v13  ;;  %137 = vst.msk [vmem:[#allocation5 + $0x50] sm:$0xff] %vm3223_vm0, %v3258_v32  ;;  %138 = vst.msk [vmem:[#allocation5 + $0x58] sm:$0xff] %vm3223_vm0, %v3258_v32  ;;  %v647_v13 = vsub.s32 %v2194_v34, %v625_v59 }
  0x65   :  { %1679 = vmatprep.subr.bf16.mxu1 %v1724_v14  ;;  %139 = vst.msk [vmem:[#allocation5 + $0x60] sm:$0xff] %vm3223_vm0, %v3258_v32  ;;  %140 = vst.msk [vmem:[#allocation5 + $0x68] sm:$0xff] %vm3223_vm0, %v3258_v32 }
  0x66   :  { %141 = vst.msk [vmem:[#allocation5 + $0x70] sm:$0xff] %vm3223_vm0, %v3258_v32  ;;  %142 = vst.msk [vmem:[#allocation5 + $0x78] sm:$0xff] %vm3223_vm0, %v3258_v32 }
  0x67   :  { %vm2203_vm3 = vmor %vm649_vm1, %vm3228_vm2  ;;  %vm2282_vm1 = vcmp.eq.s32.totalorder %v636_v63, 0 }
  0x68   :  { %1680 = vmatpush3.bf16.msra.mxu1 %v1724_v14  ;;  %vm699_vm5 = vmxor %vm2203_vm3, %vm3224_vm4  ;;  %v3352_v14 = vmov 0 }
  0x69   :  { %vm2248_vm11 = vmor %vm652_vm8, %vm3228_vm2  ;;  %vm654_vm8 = vcmp.eq.s32.totalorder %v637_v3, 0  ;;  %v3338_v3 = vmov 0 }
  0x6a   :  { %v3291_v61 = vsel %vm2248_vm11, 4294967295, %v3290_v61  ;;  %vm2259_vm12 = vmor %vm650_vm9, %vm3228_vm2 }
  0x6b   :  { %1642 = vmatpush3.bf16.xpose.msra.mxu0 %v1716_v12  ;;  %1682 = vmatmul.mubr.bf16.vlgmr.msra.gmra.mrb[0].mxu1 %v1727_v16  ;;  %v3293_v2 = vsel %vm2259_vm12, 4294967295, %v3292_v2  ;;  %vm2268_vm13 = vmor %vm651_vm10, %vm3228_vm2  ;;  %v619_v12 = vadd.s32 72, %v2196_v35  ;;  %v3357_v16 = vmov 0 }
  0x6c   :  { %1643 = vmatprep.subr.bf16.mxu0 %v1719_v15  ;;  %1685 = vmatprep.mubr.bf16.mxu1 %v1734_v17  ;;  %vm2321_vm9 = vmxor %vm2268_vm13, %vm3224_vm4  ;;  %v3308_v17 = vmov 0 }
  0x6d   :  { %vm2329_vm10 = vmor %vm2274_vm14, %vm3228_vm2 }
  0x6e   :  { %v3309_v17 = vsel %vm2329_vm10, 4294967295, %v3308_v17  ;;  %vm2349_vm14 = vmor %vm2282_vm1, %vm3228_vm2 }
  0x73   :  { %1644 = vmatpush3.bf16.xpose.msra.mxu0 %v1719_v15  ;;  %1686 = vmatmul.mubr.bf16.gmra.mrb[4].mxu1 %v1735_v19  ;;  %v1996_v15 = vmov -inf   ;;  %v643_v19 = vsub.s32 %v2194_v34, %v621_v7  ;;  %v3344_v7 = vmov 0 }
  0x74   :  { %1645 = vmatprep.subr.bf16.mxu0 %v1722_v18  ;;  %1689 = vmatprep.mubr.bf16.mxu1 %v1738_v20  ;;  %81 = vst.msk [vmem:[#allocation2 + $0x10] sm:$0xff] %vm3223_vm0, %v1996_v15  ;;  %79 = vst.msk [vmem:[#allocation2] sm:$0xff] %vm3223_vm0, %v1996_v15 }
  0x75   :  { %80 = vst.msk [vmem:[#allocation2 + $0x8] sm:$0xff] %vm3223_vm0, %v1996_v15  ;;  %82 = vst.msk [vmem:[#allocation2 + $0x18] sm:$0xff] %vm3223_vm0, %v1996_v15 }
  0x76   :  { %83 = vst.msk [vmem:[#allocation2 + $0x20] sm:$0xff] %vm3223_vm0, %v1996_v15  ;;  %84 = vst.msk [vmem:[#allocation2 + $0x28] sm:$0xff] %vm3223_vm0, %v1996_v15 }
  0x77   :  { %85 = vst.msk [vmem:[#allocation2 + $0x30] sm:$0xff] %vm3223_vm0, %v1996_v15  ;;  %86 = vst.msk [vmem:[#allocation2 + $0x38] sm:$0xff] %vm3223_vm0, %v1996_v15 }
  0x78   :  { %87 = vst.msk [vmem:[#allocation2 + $0x40] sm:$0xff] %vm3223_vm0, %v1996_v15  ;;  %88 = vst.msk [vmem:[#allocation2 + $0x48] sm:$0xff] %vm3223_vm0, %v1996_v15 }
  0x79   :  { %89 = vst.msk [vmem:[#allocation2 + $0x50] sm:$0xff] %vm3223_vm0, %v1996_v15  ;;  %90 = vst.msk [vmem:[#allocation2 + $0x58] sm:$0xff] %vm3223_vm0, %v1996_v15 }
  0x7a   :  { %91 = vst.msk [vmem:[#allocation2 + $0x60] sm:$0xff] %vm3223_vm0, %v1996_v15  ;;  %92 = vst.msk [vmem:[#allocation2 + $0x68] sm:$0xff] %vm3223_vm0, %v1996_v15 }
  0x7b   :  { %1646 = vmatpush3.bf16.xpose.msra.mxu0 %v1722_v18  ;;  %1690 = vmatmul.mubr.bf16.gmra.mrb[8].mxu1 %v1739_v22  ;;  %93 = vst.msk [vmem:[#allocation2 + $0x70] sm:$0xff] %vm3223_vm0, %v1996_v15  ;;  %94 = vst.msk [vmem:[#allocation2 + $0x78] sm:$0xff] %vm3223_vm0, %v1996_v15  ;;  %v642_v18 = vsub.s32 %v2194_v34, %v620_v6  ;;  %v3312_v22 = vmov 0  ;;  %v645_v6 = vsub.s32 %v2194_v34, %v623_v45 }
  0x7c   :  { %1647 = vmatprep.subr.bf16.mxu0 %v1726_v21  ;;  %1693 = vmatprep.mubr.bf16.mxu1 %v1740_v23  ;;  %vm2341_vm0 = vmor %vm2278_vm15, %vm3228_vm2  ;;  %v3313_v22 = vsel %vm2349_vm14, 4294967295, %v3312_v22  ;;  %vm657_vm15 = vcmp.eq.s32.totalorder %v640_v11, 0 }
  0x83   :  { %1648 = vmatpush3.bf16.xpose.msra.mxu0 %v1726_v21  ;;  %1694 = vmatmul.mubr.bf16.gmra.mrb[12].mxu1 %v1741_v24  ;;  %v3310_v21 = vmov 0  ;;  %v3314_v24 = vmov 0 }
  0x84   :  { %v3311_v21 = vsel %vm2341_vm0, 4294967295, %v3310_v21 }
  0x8a   :  { %1650 = vmatmul.mubr.bf16.vlgmr.msra.gmra.mrb[0].mxu0 %v1729_v25  ;;  %v641_v25 = vsub.s32 %v2194_v34, %v619_v12 }
  0x8b   :  { %1653 = vmatprep.mubr.bf16.mxu0 %v1730_v26 }
  0x92   :  { %1654 = vmatmul.mubr.bf16.gmra.mrb[4].mxu0 %v1731_v27  ;;  %v3317_v27 = vmov 0 }
  0x93   :  { %1657 = vmatprep.mubr.bf16.mxu0 %v1732_v28 }
  0x9a   :  { %1658 = vmatmul.mubr.bf16.gmra.mrb[8].mxu0 %v1733_v29 }
  0x9b   :  { %1661 = vmatprep.mubr.bf16.mxu0 %v1736_v30 }
  0xa2   :  { %1662 = vmatmul.mubr.bf16.gmra.mrb[12].mxu0 %v1737_v31 }
 0x13e   :  { %v2207_v38 = vpop.f32.mrb[0].mxu1 }
 0x13f   :  { %v546_v39 = vpop.f32.mrb[1].mxu1 }
 0x140   :  { %vm683_vm6 = vcmp.gt.f32.partialorder %v546_v39, 0.0  ;;  %v2212_v40 = vpop.f32.mrb[2].mxu1 }
 0x141   :  { %v2214_v41 = vpop.f32.mrb[3].mxu1  ;;  %vm2216_vm7 = vmand %vm683_vm6, %vm699_vm5 }
 0x142   :  { %v3289_v42 = vsel %vm2216_vm7, 4294967295, %v3288_v42  ;;  %v1585_v43 = vsel %vm2216_vm7, 1.0, %v3258_v32  ;;  %vm2291_vm5 = vmxor %vm2259_vm12, %vm3224_vm4  ;;  %vm3354_vm7 = vnez %v3293_v2  ;;  %v3360_v2 = vmov 0 }
 0x143   :  { %779 = vadd.xlane.f32.xlu1 %v1585_v43  ;;  %vm2298_vm6 = vmxor %vm2248_vm11, %vm3224_vm4  ;;  %vm3316_vm11 = vmmov 1   ;;  %v3326_v43 = vmov 0 }
 0x144   :  { %vm2357_vm4 = vmor %vm654_vm8, %vm3228_vm2  ;;  %vm2374_vm8 = vcmp.eq.s32.totalorder %v642_v18, 0  ;;  %vm2378_vm2 = vcmp.eq.s32.totalorder %v643_v19, 0 }
 0x145   :  { %v3315_v24 = vsel %vm2357_vm4, 4294967295, %v3314_v24  ;;  %vm2368_vm1 = vmxor %vm2329_vm10, %vm3316_vm11  ;;  %vm686_vm10 = vcmp.gt.f32.partialorder %v2212_v40, 0.0  ;;  %v646_v40 = vsub.s32 %v2194_v34, %v624_v44 }
 0x146   :  { %v2225_v46 = vpop.f32.mrb[4].mxu1  ;;  %v3318_v27 = vsel %vm2368_vm1, 4294967295, %v3317_v27  ;;  %vm2385_vm12 = vmxor %vm2357_vm4, %vm3316_vm11  ;;  %vm3325_vm1 = vcmp.ge.s32.totalorder %v2194_v34, 8 }
 0x147   :  { %v2228_v48 = vpop.f32.mrb[5].mxu1  ;;  %v3324_v33 = vsel %vm2385_vm12, 4294967295, %v3323_v33  ;;  %vm2394_vm0 = vmor %vm657_vm15, %vm3325_vm1  ;;  %vm2403_vm12 = vcmp.eq.s32.totalorder %v641_v25, 0  ;;  %vm3330_vm15 = vcmp.gt.f32.partialorder %v2207_v38, 0.0  ;;  %v2883_v38 = vld [vmem:[#allocation2 + $0x28] sm:$0xff] }
 0x148   :  { %v2230_v49 = vpop.f32.mrb[6].mxu1  ;;  %v3327_v43 = vsel %vm2394_vm0, 4294967295, %v3326_v43  ;;  %vm2412_vm1 = vmand %vm3330_vm15, %vm2321_vm9  ;;  %3437 = vst [vmem:[#allocation28_spill] sm:$0xff] %v2883_v38 }
 0x149   :  { %v2233_v51 = vpop.f32.mrb[7].mxu1  ;;  %v3332_v54 = vsel %vm2412_vm1, 4294967295, %v3331_v54  ;;  %vm2427_vm4 = vmxor %vm2349_vm14, %vm3316_vm11  ;;  %vm3356_vm1 = vcmp.gt.f32.partialorder %v2225_v46, 0.0 }
 0x14a   :  { %vm2454_vm15 = vmand %vm686_vm10, %vm2298_vm6  ;;  %vm3343_vm6 = vcmp.gt.f32.partialorder %v2214_v41, 0.0  ;;  %v644_v41 = vsub.s32 %v2194_v34, %v622_v53 }
 0x14b   :  { %v3339_v3 = vsel %vm2454_vm15, 4294967295, %v3338_v3  ;;  %vm2477_vm10 = vmand %vm3343_vm6, %vm2291_vm5  ;;  %vm3348_vm5 = vnez %v3311_v21 }
 0x14c   :  { %v3345_v7 = vsel %vm2477_vm10, 4294967295, %v3344_v7  ;;  %vm2500_vm6 = vmxor %vm3348_vm5, %vm3316_vm11 }
 0x14e   :  { %v2241_v58 = vpop.f32.mrb[8].mxu1 }
 0x14f   :  { %v2244_v60 = vpop.f32.mrb[9].mxu1 }
 0x150   :  { %v2255_v1 = vpop.f32.mrb[10].mxu1 }
 0x151   :  { %v2264_v4 = vpop.f32.mrb[11].mxu1 }
 0x156   :  { %v2335_v20 = vpop.f32.mrb[12].mxu1 }
 0x157   :  { %v2353_v23 = vpop.f32.mrb[13].mxu1 }
 0x158   :  { %v2362_v26 = vpop.f32.mrb[14].mxu1 }
 0x159   :  { %v2372_v28 = vpop.f32.mrb[15].mxu1 }
 0x15d   :  { %v1651_v29 = vpop.f32.mrb[0].mxu0 }
 0x15e   :  { %v2390_v36 = vmul.f32 10.0, %v1651_v29  ;;  %v305_v39 = vpop.f32.mrb[1].mxu0  ;;  %v3365_v29 = vmov 0 }
 0x15f   :  { %v2401_v47 = vmul.f32 10.0, %v305_v39  ;;  %v1652_v50 = vpop.f32.mrb[2].mxu0  ;;  %v3368_v39 = vmov 0 }
 0x160   :  { %v2416_v55 = vmul.f32 10.0, %v1652_v50  ;;  %v308_v56 = vpop.f32.mrb[3].mxu0  ;;  %v2421_v57 = vsel %vm2268_vm13, -1e+09, %v2390_v36  ;;  %vm3335_vm13 = vcmp.ge.s32.totalorder %v2194_v34, 8 }
 0x161   :  { %v2434_v63 = vmul.f32 10.0, %v308_v56  ;;  %976 = vmax.xlane.f32.xlu1 %v2421_v57  ;;  %v2440_v0 = vsel %vm2203_vm3, -1e+09, %v2401_v47  ;;  %vm2446_vm9 = vmor %vm2374_vm8, %vm3335_vm13  ;;  %v3386_v56 = vmov 0 }
 0x162   :  { %972 = vmax.xlane.f32.xlu0 %v2440_v0  ;;  %vm3340_vm8 = vmmov %vm3335_vm13  ;;  %v863_v8 = vsel %vm2454_vm15, %v2416_v55, 0.0 }
 0x163   :  { %vm2467_vm13 = vmor %vm2403_vm12, %vm3340_vm8  ;;  %v861_v10 = vsel %vm2477_vm10, %v2434_v63, 0.0  ;;  %vm3351_vm12 = vnez %v3291_v61  ;;  %v2522_v61 = vsel %vm3354_vm7, -1e+09, %v2434_v63  ;;  %vm663_vm10 = vcmp.eq.s32.totalorder %v646_v40, 0  ;;  %v763_v63 = vld [vmem:[#allocation5] sm:$0xff] }
 0x164   :  { %v3342_v5 = vsel %vm2467_vm13, 4294967295, %v3341_v5  ;;  %vm2489_vm3 = vmor %vm2378_vm2, %vm3340_vm8  ;;  %v2507_v12 = vsel %vm3351_vm12, -1e+09, %v2416_v55  ;;  %vm3355_vm2 = vnez %v3318_v27  ;;  %vm3359_vm7 = vcmp.gt.f32.partialorder %v2228_v48, 0.0 }
 0x165   :  { %v3347_v9 = vsel %vm2489_vm3, 4294967295, %v3346_v9  ;;  %vm2514_vm8 = vmxor %vm2394_vm0, %vm3316_vm11  ;;  %978 = vmax.xlane.f32.xlu1 %v2507_v12  ;;  %v1655_v15 = vpop.f32.mrb[4].mxu0  ;;  %vm662_vm0 = vcmp.eq.s32.totalorder %v645_v6, 0  ;;  %vm3370_vm3 = vnez %v3324_v33  ;;  %vm3371_vm13 = vcmp.gt.f32.partialorder %v2233_v51, 0.0  ;;  %v2877_v33 = vld [vmem:[#allocation2 + $0x20] sm:$0xff] }
 0x166   :  { %v3353_v14 = vsel %vm2514_vm8, 4294967295, %v3352_v14  ;;  %vm2529_vm15 = vmand %vm3356_vm1, %vm3355_vm2  ;;  %v2533_v18 = vmul.f32 10.0, %v1655_v15  ;;  %974 = vmax.xlane.f32.xlu0 %v2522_v61  ;;  %v321_v19 = vpop.f32.mrb[5].mxu0  ;;  %vm2546_vm1 = vcmp.eq.s32.totalorder %v644_v41, 0  ;;  %vm3364_vm2 = vcmp.gt.f32.partialorder %v2230_v49, 0.0  ;;  %3435 = vst [vmem:[#allocation27_spill] sm:$0xff] %v2877_v33 }
 0x167   :  { %v3358_v16 = vsel %vm2529_vm15, 4294967295, %v3357_v16  ;;  %vm2540_vm12 = vmand %vm3359_vm7, %vm2427_vm4  ;;  %v2544_v46 = vmul.f32 10.0, %v321_v19  ;;  %v1656_v25 = vpop.f32.mrb[6].mxu0  ;;  %vm3367_vm4 = vnez %v3309_v17  ;;  %vm2565_vm7 = vcmp.eq.s32.totalorder %v647_v13, 0  ;;  %v764_v19 = vld [vmem:[#allocation5 + $0x8] sm:$0xff] }
 0x168   :  { %v3361_v2 = vsel %vm2540_vm12, 4294967295, %v3360_v2  ;;  %vm2554_vm8 = vmand %vm3364_vm2, %vm2500_vm6  ;;  %v2558_v48 = vmul.f32 10.0, %v1656_v25  ;;  %v2563_v30 = vsel %vm3367_vm4, -1e+09, %v2533_v18  ;;  %v324_v31 = vpop.f32.mrb[7].mxu0  ;;  %v3369_v39 = vsel %vm2565_vm7, 4294967295, %v3368_v39 }
 0x169   :  { %v3366_v29 = vsel %vm2554_vm8, 4294967295, %v3365_v29  ;;  %vm2573_vm6 = vmand %vm3371_vm13, %vm3370_vm3  ;;  %v3372_v49 = vmov 0  ;;  %v2580_v17 = vmul.f32 10.0, %v324_v31  ;;  %vm3374_vm2 = vcmp.ge.s32.totalorder %v2194_v34, 8 }
 0x16a   :  { %v3373_v49 = vsel %vm2573_vm6, 4294967295, %v3372_v49  ;;  %vm2584_vm4 = vmor %vm663_vm10, %vm3374_vm2  ;;  %984 = vmax.xlane.f32.xlu0 %v2563_v30  ;;  %v2601_v50 = vsel %vm3348_vm5, -1e+09, %v2558_v48  ;;  %vm3383_vm5 = vnez %v3313_v22  ;;  %vm3388_vm3 = vnez %v3342_v5 }
 0x16b   :  { %vm3377_vm7 = vmmov %vm3374_vm2  ;;  %986 = vmax.xlane.f32.xlu1 %v2601_v50  ;;  %v2622_v53 = vsel %vm3383_vm5, -1e+09, %v2544_v46  ;;  %v865_v59 = vsel %vm2573_vm6, %v2580_v17, 0.0  ;;  %vm3391_vm5 = vnez %v3315_v24  ;;  %vm692_vm6 = vcmp.gt.f32.partialorder %v2264_v4, 0.0  ;;  %v2896_v4 = vld [vmem:[#allocation2 + $0x50] sm:$0xff] }
 0x16c   :  { %vm2590_vm14 = vmor %vm662_vm0, %vm3377_vm7  ;;  %v2646_v34 = vsel %vm3391_vm5, -1e+09, %v2580_v17  ;;  %vm3393_vm15 = vcmp.gt.f32.partialorder %v2241_v58, 0.0  ;;  %vm3396_vm5 = vnez %v3353_v14  ;;  %v3399_v41 = vmov 0  ;;  %3440 = vst [vmem:[#allocation31_spill] sm:$0xff] %v2896_v4 }
 0x16d   :  { %vm3380_vm13 = vmmov %vm3374_vm2  ;;  %v1997_v15 = vmov 0  }
 0x16e   :  { %vm2608_vm0 = vmor %vm2546_vm1, %vm3380_vm13  ;;  %vm691_vm1 = vcmp.gt.f32.partialorder %v2244_v60, 0.0  ;;  %v1659_v60 = vpop.f32.mrb[8].mxu0  ;;  %980 = vmax.xlane.f32.xlu0 %v2622_v53  ;;  %1708 = vset.pattern.permute.xlu1 %v1997_v15 }
 0x16f   :  { %vm709_vm10 = vmxor %vm2446_vm9, %vm3316_vm11  ;;  %v2659_v40 = vmul.f32 10.0, %v1659_v60  ;;  %v337_v24 = vpop.f32.mrb[9].mxu0  ;;  %982 = vmax.xlane.f32.xlu1 %v2646_v34  ;;  %1709 = vset.pattern.permute.xlu0 %v1997_v15 }
 0x170   :  { %vm3384_vm7 = vmmov %vm3374_vm2  ;;  %vm3385_vm2 = vnez %v3369_v39  ;;  %v2668_v6 = vmul.f32 10.0, %v337_v24  ;;  %v1660_v58 = vpop.f32.mrb[10].mxu0  ;;  %v2837_v39 = vld [vmem:[#allocation2 + $0x18] sm:$0xff] }
 0x171   :  { %vm2629_vm13 = vmor %vm3385_vm2, %vm3384_vm7  ;;  %vm694_vm7 = vcmp.gt.f32.partialorder %v2255_v1, 0.0  ;;  %vm3392_vm2 = vnez %v3347_v9  ;;  %v3397_v1 = vmov 0  ;;  %v2675_v11 = vmul.f32 10.0, %v1660_v58  ;;  %v340_v14 = vpop.f32.mrb[11].mxu0  ;;  %3423 = vst [vmem:[#allocation19_spill] sm:$0xff] %v2837_v39 }
 0x172   :  { %v3387_v56 = vsel %vm2629_vm13, 4294967295, %v3386_v56  ;;  %vm2639_vm8 = vmxor %vm3388_vm3, %vm3316_vm11  ;;  %v2680_v13 = vsel %vm2446_vm9, -1e+09, %v2659_v40  ;;  %v2693_v27 = vmul.f32 10.0, %v340_v14 }
 0x173   :  { %vm710_vm12 = vmxor %vm3392_vm2, %vm3316_vm11  ;;  %992 = vmax.xlane.f32.xlu0 %v2680_v13  ;;  %v2709_v31 = vsel %vm3392_vm2, -1e+09, %v2675_v11  ;;  %vm3406_vm2 = vnez %v3342_v5 }
 0x174   :  { %vm2655_vm13 = vmand %vm3393_vm15, %vm709_vm10  ;;  %994 = vmax.xlane.f32.xlu1 %v2709_v31  ;;  %v2734_v9 = vsel %vm3406_vm2, -1e+09, %v2693_v27 }
 0x175   :  { %v3395_v62 = vsel %vm2655_vm13, 4294967295, %v3394_v62  ;;  %vm2664_vm3 = vmand %vm691_vm1, %vm3396_vm5  ;;  %vm695_vm1 = vcmp.gt.f32.partialorder %v2353_v23, 0.0  ;;  %vm698_vm5 = vcmp.gt.f32.partialorder %v2362_v26, 0.0  ;;  %v1663_v23 = vpop.f32.mrb[12].mxu0  ;;  %vm696_vm13 = vcmp.gt.f32.partialorder %v2372_v28, 0.0  ;;  %v766_v28 = vld [vmem:[#allocation5 + $0x18] sm:$0xff] }
 0x176   :  { %v3398_v1 = vsel %vm2664_vm3, 4294967295, %v3397_v1  ;;  %vm2671_vm15 = vmand %vm694_vm7, %vm710_vm12  ;;  %v2746_v60 = vmul.f32 10.0, %v1663_v23  ;;  %v353_v5 = vpop.f32.mrb[13].mxu0 }
 0x177   :  { %v3400_v41 = vsel %vm2671_vm15, 4294967295, %v3399_v41  ;;  %vm2686_vm10 = vmand %vm692_vm6, %vm2639_vm8  ;;  %vm697_vm8 = vcmp.gt.f32.partialorder %v2335_v20, 0.0  ;;  %vm3405_vm6 = vnez %v3327_v43  ;;  %v2753_v26 = vmul.f32 10.0, %v353_v5  ;;  %v1664_v58 = vpop.f32.mrb[14].mxu0 }
 0x178   :  { %vm2698_vm9 = vmxor %vm2590_vm14, %vm3316_vm11  ;;  %v2722_v22 = vsel %vm3405_vm6, -1e+09, %v2668_v6  ;;  %vm3407_vm6 = vnez %v3387_v56  ;;  %990 = vmax.xlane.f32.xlu1 %v2734_v9  ;;  %v2762_v14 = vsel %vm2584_vm4, -1e+09, %v2746_v60  ;;  %v2764_v15 = vmul.f32 10.0, %v1664_v58  ;;  %v356_v23 = vpop.f32.mrb[15].mxu0 }
 0x179   :  { %vm713_vm12 = vmxor %vm2584_vm4, %vm3316_vm11  ;;  %988 = vmax.xlane.f32.xlu0 %v2722_v22  ;;  %v2775_v20 = vmul.f32 10.0, %v356_v23  ;;  %v2792_v23 = vsel %vm2608_vm0, -1e+09, %v2753_v26  ;;  %vm3416_vm4 = vnez %v3358_v16  ;;  %v2829_v58 = vld [vmem:[#allocation2] sm:$0xff] }
 0x17a   :  { %vm711_vm7 = vmxor %vm2608_vm0, %vm3316_vm11  ;;  %v2784_v35 = vsel %vm3407_vm6, -1e+09, %v2764_v15  ;;  %v1591_v45 = vsel %vm3416_vm4, 1.0, %v3258_v32  ;;  %vm3417_vm0 = vnez %v3345_v7 }
 0x17b   :  { %vm714_vm15 = vmxor %vm3407_vm6, %vm3316_vm11  ;;  %v2801_v56 = vsel %vm2590_vm14, -1e+09, %v2775_v20  ;;  %vm3419_vm14 = vnez %v3339_v3 }
 0x17c   :  { %vm2741_vm3 = vmand %vm697_vm8, %vm713_vm12  ;;  %1002 = vmax.xlane.f32.xlu1 %v2784_v35  ;;  %vm3422_vm12 = vcmask 7168  }
 0x17d   :  { %vm2748_vm2 = vmand %vm695_vm1, %vm711_vm7  ;;  %1000 = vmax.xlane.f32.xlu0 %v2762_v14 }
 0x17e   :  { %vm2755_vm11 = vmand %vm698_vm5, %vm714_vm15  ;;  %vm3420_vm15 = vnez %v3395_v62 }
 0x17f   :  { %vm2768_vm8 = vmand %vm696_vm13, %vm2698_vm9  ;;  %vm3418_vm13 = vnez %v3398_v1  ;;  %v1595_v52 = vsel %vm3420_vm15, 1.0, %v3258_v32  ;;  %vm3421_vm9 = vnez %v3373_v49  ;;  %v3482_v1 = vsel %vm3420_vm15, %v2659_v40, 0.0  ;;  %v765_v40 = vld [vmem:[#allocation5 + $0x10] sm:$0xff] }
 0x180   :  { %998 = vmax.xlane.f32.xlu1 %v2801_v56  ;;  %v1593_v51 = vsel %vm3418_vm13, 1.0, %v3258_v32  ;;  %vm3424_vm1 = vmmov %vm3422_vm12 }
 0x181   :  { %996 = vmax.xlane.f32.xlu0 %v2792_v23  ;;  %vm3426_vm7 = vmmov %vm3424_vm1 }
 0x182   :  { %vm3429_vm5 = vmmov %vm3424_vm1 }
 0x183   :  { %vm3431_vm6 = vmmov %vm3424_vm1 }
 0x184   :  { %vm3493_vm15 = vmmov %vm3424_vm1 }
 0x185   :  { %791 = vadd.xlane.f32.xlu0 %v1591_v45 }
 0x189   :  { %878 = vadd.xlane.f32.xlu0 %v861_v10 }
 0x18d   :  { %795 = vadd.xlane.f32.xlu0 %v1593_v51  ;;  %v2827_v51 = vld [vmem:[#allocation2 + $0x10] sm:$0xff] }
 0x191   :  { %882 = vadd.xlane.f32.xlu0 %v863_v8 }
 0x195   :  { %799 = vadd.xlane.f32.xlu0 %v1595_v52 }
 0x199   :  { %886 = vadd.xlane.f32.xlu0 %v865_v59  ;;  %v2844_v59 = vld [vmem:[#allocation2 + $0x8] sm:$0xff] }
 0x19a   :  { %3425 = vst [vmem:[#allocation20_spill] sm:$0xff] %v2844_v59 }
 0x1d0   :  { %v780_v10 = vpop.xlane.xlu1 %779 }
 0x1d1   :  { %v811_v45 = vadd.f32 %v780_v10, %v763_v63  ;;  %v2862_v63 = vld [vmem:[#allocation2 + $0x30] sm:$0xff] }
 0x1d2   :  { %3430 = vst [vmem:[#allocation23_spill] sm:$0xff] %v2862_v63 }
 0x1d3   :  { %828 = vst.msk [vmem:[#allocation5] sm:$0xff] %vm3422_vm12, %v811_v45  ;;  %vm3436_vm12 = vmmov %vm3424_vm1 }
 0x1ee   :  { %v977_v55 = vpop.xlane.xlu1 %976 }
 0x1ef   :  { %v2832_v8 = vmax.f32 %v2827_v51, %v977_v55  ;;  %v973_v5 = vpop.xlane.xlu0 %972 }
 0x1f0   :  { %v2835_v52 = vmax.f32 %v2829_v58, %v973_v5 }
 0x1f1   :  { %1294 = vst.msk [vmem:[#allocation2 + $0x10] sm:$0xff] %vm3424_vm1, %v2832_v8  ;;  %1112 = vperm.xlu1 %1708, %v2832_v8  }
 0x1f2   :  { %1292 = vst.msk [vmem:[#allocation2] sm:$0xff] %vm3426_vm7, %v2835_v52  ;;  %v979_v5 = vpop.xlane.xlu1 %978  ;;  %1102 = vperm.xlu0 %1709, %v2835_v52   ;;  %vm3441_vm7 = vmmov %vm3424_vm1 }
 0x1f3   :  { %v2852_v10 = vmax.f32 %v2837_v39, %v979_v5  ;;  %v975_v45 = vpop.xlane.xlu0 %974  ;;  %v2868_v5 = vld [vmem:[#allocation2 + $0x38] sm:$0xff] }
 0x1f4   :  { %v2855_v55 = vmax.f32 %v2844_v59, %v975_v45  ;;  %3432 = vst [vmem:[#allocation24_spill] sm:$0xff] %v2868_v5 }
 0x1f5   :  { %3427 = vst [vmem:[#allocation21_spill] sm:$0xff] %v2852_v10  ;;  %1295 = vst.msk [vmem:[#allocation2 + $0x18] sm:$0xff] %vm3429_vm5, %v2852_v10  ;;  %1117 = vperm.xlu1 %1708, %v2852_v10  }
 0x1f6   :  { %3428 = vst [vmem:[#allocation22_spill] sm:$0xff] %v2855_v55  ;;  %1293 = vst.msk [vmem:[#allocation2 + $0x8] sm:$0xff] %vm3431_vm6, %v2855_v55 }
 0x1f7   :  { %v985_v45 = vpop.xlane.xlu0 %984  ;;  %vm3443_vm5 = vmmov %vm3424_vm1 }
 0x1f8   :  { %v2871_v44 = vmax.f32 %v2862_v63, %v985_v45  ;;  %v987_v17 = vpop.xlane.xlu1 %986  ;;  %v2902_v45 = vld [vmem:[#allocation2 + $0x58] sm:$0xff]  ;;  %v2915_v63 = vld [vmem:[#allocation2 + $0x40] sm:$0xff]  ;;  %vm3446_vm6 = vmmov %vm3424_vm1 }
 0x1f9   :  { %v2874_v21 = vmax.f32 %v2868_v5, %v987_v17  ;;  %1107 = vperm.xlu1 %1708, %v2855_v55   ;;  %3442 = vst [vmem:[#allocation32_spill] sm:$0xff] %v2902_v45  ;;  %3445 = vst [vmem:[#allocation34_spill] sm:$0xff] %v2915_v63 }
 0x1fa   :  { %3433 = vst [vmem:[#allocation25_spill] sm:$0xff] %v2871_v44  ;;  %1298 = vst.msk [vmem:[#allocation2 + $0x30] sm:$0xff] %vm3436_vm12, %v2871_v44 }
 0x1fb   :  { %3434 = vst [vmem:[#allocation26_spill] sm:$0xff] %v2874_v21  ;;  %1299 = vst.msk [vmem:[#allocation2 + $0x38] sm:$0xff] %vm3424_vm1, %v2874_v21  ;;  %v981_v17 = vpop.xlane.xlu0 %980 }
 0x1fc   :  { %v2890_v37 = vmax.f32 %v2877_v33, %v981_v17  ;;  %v983_v32 = vpop.xlane.xlu1 %982  ;;  %v2921_v17 = vld [vmem:[#allocation2 + $0x48] sm:$0xff]  ;;  %vm3448_vm12 = vmmov %vm3424_vm1  ;;  %v2934_v33 = vld [vmem:[#allocation2 + $0x70] sm:$0xff] }
 0x1fd   :  { %v2893_v55 = vmax.f32 %v2883_v38, %v983_v32  ;;  %1132 = vperm.xlu1 %1708, %v2871_v44   ;;  %3447 = vst [vmem:[#allocation35_spill] sm:$0xff] %v2921_v17  ;;  %3451 = vst [vmem:[#allocation38_spill] sm:$0xff] %v2934_v33 }
 0x1fe   :  { %3438 = vst [vmem:[#allocation29_spill] sm:$0xff] %v2890_v37  ;;  %1296 = vst.msk [vmem:[#allocation2 + $0x20] sm:$0xff] %vm3441_vm7, %v2890_v37 }
 0x1ff   :  { %3439 = vst [vmem:[#allocation30_spill] sm:$0xff] %v2893_v55  ;;  %1297 = vst.msk [vmem:[#allocation2 + $0x28] sm:$0xff] %vm3443_vm5, %v2893_v55 }
 0x200   :  { %v993_v32 = vpop.xlane.xlu0 %992  ;;  %vm3453_vm7 = vmmov %vm3424_vm1 }
 0x201   :  { %v2909_v5 = vmax.f32 %v2896_v4, %v993_v32  ;;  %v995_v44 = vpop.xlane.xlu1 %994  ;;  %1122 = vperm.xlu1 %1708, %v2890_v37   ;;  %v2940_v32 = vld [vmem:[#allocation2 + $0x78] sm:$0xff]  ;;  %v2951_v4 = vld [vmem:[#allocation2 + $0x60] sm:$0xff]  ;;  %vm3457_vm5 = vmmov %vm3424_vm1 }
 0x202   :  { %v2912_v59 = vmax.f32 %v2902_v45, %v995_v44  ;;  %3452 = vst [vmem:[#allocation39_spill] sm:$0xff] %v2940_v32  ;;  %3455 = vst [vmem:[#allocation41_spill] sm:$0xff] %v2951_v4 }
 0x203   :  { %3444 = vst [vmem:[#allocation33_spill] sm:$0xff] %v2909_v5  ;;  %1302 = vst.msk [vmem:[#allocation2 + $0x50] sm:$0xff] %vm3446_vm6, %v2909_v5 }
 0x204   :  { %1303 = vst.msk [vmem:[#allocation2 + $0x58] sm:$0xff] %vm3448_vm12, %v2912_v59  ;;  %vm3459_vm6 = vmmov %vm3424_vm1 }
 0x205   :  { %v991_v37 = vpop.xlane.xlu1 %990  ;;  %1137 = vperm.xlu1 %1708, %v2874_v21   ;;  %vm3461_vm12 = vmmov %vm3424_vm1 }
 0x206   :  { %v989_v44 = vpop.xlane.xlu0 %988  ;;  %v2931_v10 = vmax.f32 %v2921_v17, %v991_v37  ;;  %v2960_v17 = vld [vmem:[#allocation2 + $0x68] sm:$0xff] }
 0x207   :  { %v2928_v38 = vmax.f32 %v2915_v63, %v989_v44  ;;  %3458 = vst [vmem:[#allocation43_spill] sm:$0xff] %v2960_v17  ;;  %v769_v44 = vld [vmem:[#allocation5 + $0x30] sm:$0xff] }
 0x208   :  { %3450 = vst [vmem:[#allocation37_spill] sm:$0xff] %v2931_v10  ;;  %1301 = vst.msk [vmem:[#allocation2 + $0x48] sm:$0xff] %vm3453_vm7, %v2931_v10  ;;  %1147 = vperm.xlu0 %1709, %v2931_v10  }
 0x209   :  { %3449 = vst [vmem:[#allocation36_spill] sm:$0xff] %v2928_v38  ;;  %1300 = vst.msk [vmem:[#allocation2 + $0x40] sm:$0xff] %vm3424_vm1, %v2928_v38  ;;  %v1003_v45 = vpop.xlane.xlu1 %1002  ;;  %1127 = vperm.xlu1 %1708, %v2893_v55  }
 0x20a   :  { %v1001_v37 = vpop.xlane.xlu0 %1000  ;;  %v2954_v63 = vmax.f32 %v2940_v32, %v1003_v45  ;;  %vm3462_vm7 = vmmov %vm3424_vm1 }
 0x20b   :  { %v2948_v21 = vmax.f32 %v2934_v33, %v1001_v37 }
 0x20c   :  { %3456 = vst [vmem:[#allocation42_spill] sm:$0xff] %v2954_v63  ;;  %1157 = vperm.xlu0 %1709, %v2912_v59   ;;  %1307 = vst.msk [vmem:[#allocation2 + $0x78] sm:$0xff] %vm3459_vm6, %v2954_v63 }
 0x20d   :  { %3454 = vst [vmem:[#allocation40_spill] sm:$0xff] %v2948_v21  ;;  %1306 = vst.msk [vmem:[#allocation2 + $0x70] sm:$0xff] %vm3457_vm5, %v2948_v21  ;;  %v999_v55 = vpop.xlane.xlu1 %998  ;;  %1152 = vperm.xlu1 %1708, %v2909_v5  }
 0x20e   :  { %v997_v10 = vpop.xlane.xlu0 %996  ;;  %v2972_v33 = vmax.f32 %v2960_v17, %v999_v55  ;;  %v845_v55 = vld [vmem:[#allocation4 + $0x8] sm:$0xff]  ;;  %vm3463_vm5 = vmmov %vm3424_vm1  ;;  %v847_v17 = vld [vmem:[#allocation4 + $0x18] sm:$0xff] }
 0x20f   :  { %v2968_v45 = vmax.f32 %v2951_v4, %v997_v10  ;;  %v771_v4 = vld [vmem:[#allocation5 + $0x40] sm:$0xff]  ;;  %vm3464_vm6 = vmmov %vm3424_vm1 }
 0x210   :  { %3460 = vst [vmem:[#allocation44_spill] sm:$0xff] %v2972_v33  ;;  %1177 = vperm.xlu0 %1709, %v2954_v63   ;;  %1305 = vst.msk [vmem:[#allocation2 + $0x68] sm:$0xff] %vm3424_vm1, %v2972_v33 }
 0x211   :  { %1304 = vst.msk [vmem:[#allocation2 + $0x60] sm:$0xff] %vm3461_vm12, %v2968_v45  ;;  %1142 = vperm.xlu1 %1708, %v2928_v38   ;;  %v773_v38 = vld [vmem:[#allocation5 + $0x50] sm:$0xff]  ;;  %vm3465_vm12 = vmmov %vm3424_vm1 }
 0x212   :  { %v792_v37 = vpop.xlane.xlu0 %791 }
 0x213   :  { %v817_v5 = vadd.f32 %v792_v37, %v769_v44 }
 0x214   :  { %1167 = vperm.xlu0 %1709, %v2972_v33  }
 0x215   :  { %834 = vst.msk [vmem:[#allocation5 + $0x30] sm:$0xff] %vm3462_vm7, %v817_v5  ;;  %1172 = vperm.xlu1 %1708, %v2948_v21   ;;  %vm3466_vm7 = vmmov %vm3424_vm1 }
 0x216   :  { %v879_v32 = vpop.xlane.xlu0 %878 }
 0x217   :  { %v909_v39 = vadd.f32 %v879_v32, %v845_v55  ;;  %v849_v32 = vld [vmem:[#allocation4 + $0x28] sm:$0xff] }
 0x219   :  { %925 = vst.msk [vmem:[#allocation4 + $0x8] sm:$0xff] %vm3463_vm5, %v909_v39  ;;  %1162 = vperm.xlu1 %1708, %v2968_v45   ;;  %vm3468_vm5 = vnez %v3332_v54 }
 0x21a   :  { %v796_v63 = vpop.xlane.xlu0 %795 }
 0x21b   :  { %v819_v10 = vadd.f32 %v796_v63, %v771_v4  ;;  %v3467_v4 = vmov 0.0  }
 0x21c   :  { %v1586_v39 = vsel %vm3417_vm0, 1.0, %v3467_v4  ;;  %v1587_v63 = vsel %vm3468_vm5, 1.0, %v3467_v4  ;;  %v1590_v7 = vsel %vm3421_vm9, 1.0, %v3467_v4  ;;  %vm3470_vm0 = vnez %v3289_v42  ;;  %vm3494_vm9 = vmmov %vm3424_vm1 }
 0x21d   :  { %836 = vst.msk [vmem:[#allocation5 + $0x40] sm:$0xff] %vm3464_vm6, %v819_v10  ;;  %vm3469_vm6 = vnez %v3361_v2  ;;  %v1594_v49 = vsel %vm2686_vm10, 1.0, %v3467_v4 }
 0x21e   :  { %v883_v44 = vpop.xlane.xlu0 %882  ;;  %v3474_v42 = vsel %vm3469_vm6, %v2544_v46, 0.0 }
 0x21f   :  { %v911_v37 = vadd.f32 %v883_v44, %v847_v17  ;;  %v3473_v17 = vsel %vm3468_vm5, %v2390_v36, 0.0  ;;  %vm3507_vm5 = vmmov %vm3424_vm1 }
 0x221   :  { %927 = vst.msk [vmem:[#allocation4 + $0x18] sm:$0xff] %vm3465_vm12, %v911_v37  ;;  %vm3472_vm12 = vnez %v3366_v29 }
 0x222   :  { %v800_v5 = vpop.xlane.xlu0 %799  ;;  %v1592_v3 = vsel %vm3472_vm12, 1.0, %v3467_v4 }
 0x223   :  { %v821_v33 = vadd.f32 %v800_v5, %v773_v38  ;;  %v1588_v38 = vsel %vm3419_vm14, 1.0, %v3467_v4  ;;  %vm3475_vm14 = vnez %v3400_v41  ;;  %v3484_v41 = vsel %vm2748_vm2, %v2753_v26, 0.0  ;;  %v767_v26 = vld [vmem:[#allocation5 + $0x20] sm:$0xff] }
 0x225   :  { %838 = vst.msk [vmem:[#allocation5 + $0x50] sm:$0xff] %vm3424_vm1, %v821_v33  ;;  %v1589_v33 = vsel %vm3469_vm6, 1.0, %v3467_v4  ;;  %vm3513_vm6 = vmmov %vm3424_vm1 }
 0x226   :  { %v887_v55 = vpop.xlane.xlu0 %886 }
 0x227   :  { %v913_v21 = vadd.f32 %v887_v55, %v849_v32 }
 0x229   :  { %929 = vst.msk [vmem:[#allocation4 + $0x28] sm:$0xff] %vm3466_vm7, %v913_v21  ;;  %v3471_v21 = vsel %vm3470_vm0, %v2401_v47, 0.0  ;;  %vm3506_vm7 = vmmov %vm3424_vm1 }
 0x22a   :  { %vm3514_vm0 = vmmov %vm3424_vm1 }
 0x23d   :  { %781 = vadd.xlane.f32.xlu1 %v1586_v39 }
 0x241   :  { %783 = vadd.xlane.f32.xlu1 %v1587_v63 }
 0x245   :  { %785 = vadd.xlane.f32.xlu1 %v1588_v38 }
 0x249   :  { %787 = vadd.xlane.f32.xlu1 %v1589_v33 }
 0x24d   :  { %789 = vadd.xlane.f32.xlu1 %v1590_v7  ;;  %v1597_v7 = vsel %vm2748_vm2, 1.0, %v3467_v4  ;;  %vm3488_vm2 = vmmov %vm3424_vm1 }
 0x251   :  { %876 = vadd.xlane.f32.xlu1 %v3471_v21 }
 0x255   :  { %793 = vadd.xlane.f32.xlu1 %v1592_v3 }
 0x259   :  { %880 = vadd.xlane.f32.xlu1 %v3473_v17 }
 0x25d   :  { %797 = vadd.xlane.f32.xlu1 %v1594_v49 }
 0x261   :  { %884 = vadd.xlane.f32.xlu1 %v3474_v42 }
 0x270   :  { %v1113_v47 = vpop.permute.xlu1 %1112 }
 0x271   :  { %v1182_v10 = vsub.f32 %v2421_v57, %v1113_v47  ;;  %v1103_v44 = vpop.permute.xlu0 %1102 }
 0x272   :  { %v1180_v37 = vsub.f32 %v2440_v0, %v1103_v44 }
 0x273   :  { %v1200_v54 = vmul.f32 1.442695, %v1182_v10  ;;  %v3477_v10 = vsel %vm3416_vm4, %v2533_v18, 0.0  ;;  %vm3491_vm4 = vmmov %vm3424_vm1 }
 0x274   :  { %v1196_v5 = vmul.f32 1.442695, %v1180_v37  ;;  %v1118_v36 = vpop.permute.xlu1 %1117 }
 0x275   :  { %1742 = vpow2.f32 %v1200_v54  ;;  %v1183_v55 = vsub.f32 %v2507_v12, %v1118_v36  ;;  %v1596_v12 = vsel %vm3475_vm14, 1.0, %v3467_v4 }
 0x276   :  { %1744 = vpow2.f32 %v1196_v5 }
 0x277   :  { %v1202_v63 = vmul.f32 1.442695, %v1183_v55 }
 0x278   :  { %v1108_v32 = vpop.permute.xlu1 %1107 }
 0x279   :  { %v1181_v2 = vsub.f32 %v2522_v61, %v1108_v32  ;;  %1746 = vpow2.f32 %v1202_v63 }
 0x27b   :  { %v1198_v57 = vmul.f32 1.442695, %v1181_v2 }
 0x27c   :  { %v1133_v39 = vpop.permute.xlu1 %1132 }
 0x27d   :  { %v1186_v0 = vsub.f32 %v2563_v30, %v1133_v39  ;;  %1748 = vpow2.f32 %v1198_v57  ;;  %v3476_v30 = vsel %vm3472_vm12, %v2558_v48, 0.0  ;;  %vm3518_vm12 = vmmov %vm3514_vm0 }
 0x27f   :  { %v1743_v46 = vpop.eup %1742  ;;  %v1208_v61 = vmul.f32 1.442695, %v1186_v0 }
 0x280   :  { %v1745_v38 = vpop.eup %1744  ;;  %v1123_v33 = vpop.permute.xlu1 %1122  ;;  %1232 = vadd.xlane.f32.xlu0 %v1743_v46 }
 0x281   :  { %1228 = vadd.xlane.f32.xlu1 %v1745_v38  ;;  %v1184_v3 = vsub.f32 %v2622_v53, %v1123_v33  ;;  %1750 = vpow2.f32 %v1208_v61 }
 0x283   :  { %v1204_v42 = vmul.f32 1.442695, %v1184_v3  ;;  %v1747_v37 = vpop.eup %1746 }
 0x284   :  { %v1138_v21 = vpop.permute.xlu1 %1137  ;;  %803 = vadd.xlane.f32.xlu0 %v1597_v7 }
 0x285   :  { %801 = vadd.xlane.f32.xlu1 %v1596_v12  ;;  %v1187_v47 = vsub.f32 %v2601_v50, %v1138_v21  ;;  %1752 = vpow2.f32 %v1204_v42 }
 0x287   :  { %v1148_v17 = vpop.permute.xlu0 %1147  ;;  %v1210_v29 = vmul.f32 1.442695, %v1187_v47  ;;  %v1749_v50 = vpop.eup %1748  ;;  %v1598_v47 = vsel %vm2768_vm8, 1.0, %v3467_v4 }
 0x288   :  { %v1128_v49 = vpop.permute.xlu1 %1127  ;;  %890 = vadd.xlane.f32.xlu0 %v3476_v30  ;;  %v1189_v53 = vsub.f32 %v2734_v9, %v1148_v17 }
 0x289   :  { %888 = vadd.xlane.f32.xlu1 %v3477_v10  ;;  %v1185_v48 = vsub.f32 %v2646_v34, %v1128_v49  ;;  %v1599_v10 = vsel %vm2741_vm3, 1.0, %v3467_v4 }
 0x28a   :  { %v1214_v55 = vmul.f32 1.442695, %v1189_v53  ;;  %v3478_v53 = vsel %vm3418_vm13, %v2668_v6, 0.0  ;;  %v3483_v6 = vsel %vm2755_vm11, %v2764_v15, 0.0  ;;  %vm3492_vm13 = vmmov %vm3424_vm1 }
 0x28b   :  { %v1158_v44 = vpop.permute.xlu0 %1157  ;;  %v1206_v39 = vmul.f32 1.442695, %v1185_v48  ;;  %v1751_v63 = vpop.eup %1750 }
 0x28c   :  { %v1191_v54 = vsub.f32 %v2709_v31, %v1158_v44  ;;  %v1153_v5 = vpop.permute.xlu1 %1152  ;;  %1234 = vadd.xlane.f32.xlu0 %v1747_v37  ;;  %v1600_v37 = vsel %vm2755_vm11, 1.0, %v3467_v4  ;;  %v3481_v4 = vsel %vm2768_vm8, %v2775_v20, 0.0  ;;  %vm3487_vm11 = vmmov %vm3424_vm1 }
 0x28d   :  { %v1190_v9 = vsub.f32 %v2680_v13, %v1153_v5  ;;  %v3480_v5 = vsel %vm2686_vm10, %v2693_v27, 0.0  ;;  %vm3486_vm10 = vmmov %vm3424_vm1 }
 0x28e   :  { %v1218_v36 = vmul.f32 1.442695, %v1191_v54  ;;  %v3479_v54 = vsel %vm3475_vm14, %v2675_v11, 0.0  ;;  %v3485_v11 = vsel %vm2741_vm3, %v2746_v60, 0.0  ;;  %v768_v60 = vld [vmem:[#allocation5 + $0x28] sm:$0xff]  ;;  %vm3489_vm3 = vmmov %vm3424_vm1 }
 0x28f   :  { %v1178_v32 = vpop.permute.xlu0 %1177  ;;  %v1216_v38 = vmul.f32 1.442695, %v1190_v9  ;;  %v1753_v57 = vpop.eup %1752  ;;  %vm3490_vm8 = vmmov %vm3424_vm1  ;;  %v846_v9 = vld [vmem:[#allocation4 + $0x10] sm:$0xff] }
 0x290   :  { %1754 = vpow2.f32 %v1218_v36  ;;  %v1195_v16 = vsub.f32 %v2784_v35, %v1178_v32  ;;  %v1143_v18 = vpop.permute.xlu1 %1142  ;;  %1230 = vadd.xlane.f32.xlu0 %v1749_v50  ;;  %v844_v32 = vld [vmem:[#allocation4] sm:$0xff]  ;;  %vm3522_vm14 = vmmov %vm3514_vm0 }
 0x291   :  { %1756 = vpow2.f32 %v1210_v29  ;;  %v1188_v33 = vsub.f32 %v2722_v22, %v1143_v18 }
 0x292   :  { %1758 = vpow2.f32 %v1214_v55  ;;  %v1226_v2 = vmul.f32 1.442695, %v1195_v16  ;;  %v770_v16 = vld [vmem:[#allocation5 + $0x38] sm:$0xff] }
 0x293   :  { %v1168_v31 = vpop.permute.xlu0 %1167  ;;  %1760 = vpow2.f32 %v1206_v39  ;;  %v1212_v7 = vmul.f32 1.442695, %v1188_v33 }
 0x294   :  { %v1193_v46 = vsub.f32 %v2801_v56, %v1168_v31  ;;  %v1173_v34 = vpop.permute.xlu1 %1172  ;;  %1240 = vadd.xlane.f32.xlu0 %v1751_v63  ;;  %1762 = vpow2.f32 %v1226_v2  ;;  %v772_v2 = vld [vmem:[#allocation5 + $0x48] sm:$0xff] }
 0x295   :  { %1764 = vpow2.f32 %v1216_v38  ;;  %v1194_v13 = vsub.f32 %v2762_v14, %v1173_v34  ;;  %v848_v38 = vld [vmem:[#allocation4 + $0x20] sm:$0xff] }
 0x296   :  { %v1222_v35 = vmul.f32 1.442695, %v1193_v46 }
 0x297   :  { %v1224_v61 = vmul.f32 1.442695, %v1194_v13 }
 0x298   :  { %1236 = vadd.xlane.f32.xlu0 %v1753_v57  ;;  %v1163_v21 = vpop.permute.xlu1 %1162  ;;  %1766 = vpow2.f32 %v1222_v35  ;;  %v3495_v35 = vsub.f32 %v2827_v51, %v2832_v8 }
 0x299   :  { %1768 = vpow2.f32 %v1212_v7  ;;  %v1192_v3 = vsub.f32 %v2792_v23, %v1163_v21  ;;  %v3496_v7 = vsub.f32 %v2829_v58, %v2835_v52  ;;  %v3497_v21 = vld [vmem:[#allocation19_spill] sm:$0xff] }
 0x29a   :  { %v1755_v0 = vpop.eup %1754  ;;  %1770 = vpow2.f32 %v1224_v61 }
 0x29b   :  { %1250 = vadd.xlane.f32.xlu1 %v1755_v0  ;;  %v1757_v12 = vpop.eup %1756  ;;  %v1220_v49 = vmul.f32 1.442695, %v1192_v3  ;;  %v1056_v0 = vmul.f32 1.442695, %v3495_v35  ;;  %v1052_v13 = vmul.f32 1.442695, %v3496_v7 }
 0x29c   :  { %1242 = vadd.xlane.f32.xlu0 %v1757_v12  ;;  %v1759_v56 = vpop.eup %1758  ;;  %v3498_v12 = vld [vmem:[#allocation21_spill] sm:$0xff]  ;;  %v3524_v35 = vld [vmem:[#allocation30_spill] sm:$0xff] }
 0x29d   :  { %v1761_v22 = vpop.eup %1760  ;;  %1772 = vpow2.f32 %v1220_v49  ;;  %v1020_v49 = vld [vmem:[#allocation3] sm:$0xff] }
 0x29e   :  { %v1763_v17 = vpop.eup %1762  ;;  %1774 = vpow2.f32 %v1056_v0 }
 0x29f   :  { %1246 = vadd.xlane.f32.xlu1 %v1759_v56  ;;  %v1765_v30 = vpop.eup %1764  ;;  %1776 = vpow2.f32 %v1052_v13  ;;  %v3499_v56 = vsub.f32 %v3497_v21, %v3498_v12 }
 0x2a0   :  { %1238 = vadd.xlane.f32.xlu0 %v1761_v22  ;;  %v1022_v22 = vld [vmem:[#allocation3 + $0x10] sm:$0xff] }
 0x2a1   :  { %v1058_v61 = vmul.f32 1.442695, %v3499_v56  ;;  %v3527_v56 = vld [vmem:[#allocation39_spill] sm:$0xff] }
 0x2a2   :  { %v1767_v14 = vpop.eup %1766 }
 0x2a3   :  { %1258 = vadd.xlane.f32.xlu1 %v1763_v17  ;;  %v1769_v42 = vpop.eup %1768  ;;  %1778 = vpow2.f32 %v1058_v61  ;;  %v3528_v61 = vld [vmem:[#allocation42_spill] sm:$0xff] }
 0x2a4   :  { %1248 = vadd.xlane.f32.xlu0 %v1765_v30  ;;  %v1771_v23 = vpop.eup %1770  ;;  %v3500_v30 = vld [vmem:[#allocation20_spill] sm:$0xff] }
 0x2a7   :  { %1254 = vadd.xlane.f32.xlu1 %v1767_v14  ;;  %v1773_v44 = vpop.eup %1772  ;;  %v3501_v14 = vld [vmem:[#allocation22_spill] sm:$0xff] }
 0x2a8   :  { %1244 = vadd.xlane.f32.xlu0 %v1769_v42  ;;  %v1775_v3 = vpop.eup %1774  ;;  %v3502_v42 = vsub.f32 %v3500_v30, %v3501_v14  ;;  %v3530_v14 = vld [vmem:[#allocation31_spill] sm:$0xff] }
 0x2a9   :  { %v1777_v17 = vpop.eup %1776  ;;  %v1086_v8 = vmul.f32 %v1775_v3, %v1022_v22  ;;  %v3529_v3 = vsub.f32 %v3527_v56, %v3528_v61  ;;  %v1035_v56 = vld [vmem:[#allocation3 + $0x78] sm:$0xff] }
 0x2aa   :  { %v1054_v51 = vmul.f32 1.442695, %v3502_v42  ;;  %v3531_v42 = vld [vmem:[#allocation33_spill] sm:$0xff] }
 0x2ab   :  { %805 = vadd.xlane.f32.xlu1 %v1598_v47  ;;  %v1082_v22 = vmul.f32 1.442695, %v3529_v3 }
 0x2ac   :  { %1256 = vadd.xlane.f32.xlu0 %v1771_v23  ;;  %v1084_v23 = vmul.f32 %v1777_v17, %v1020_v49  ;;  %1780 = vpow2.f32 %v1054_v51  ;;  %v1026_v49 = vld [vmem:[#allocation3 + $0x30] sm:$0xff]  ;;  %v3532_v51 = vsub.f32 %v3530_v14, %v3531_v42 }
 0x2ad   :  { %v1030_v14 = vld [vmem:[#allocation3 + $0x50] sm:$0xff] }
 0x2af   :  { %807 = vadd.xlane.f32.xlu1 %v1599_v10  ;;  %v3503_v10 = vld [vmem:[#allocation23_spill] sm:$0xff] }
 0x2b0   :  { %1252 = vadd.xlane.f32.xlu0 %v1773_v44  ;;  %v3504_v44 = vld [vmem:[#allocation25_spill] sm:$0xff] }
 0x2b3   :  { %809 = vadd.xlane.f32.xlu1 %v1600_v37  ;;  %v3505_v37 = vsub.f32 %v3503_v10, %v3504_v44 }
 0x2b4   :  { %892 = vadd.xlane.f32.xlu0 %v3478_v53 }
 0x2b5   :  { %v1064_v53 = vmul.f32 1.442695, %v3505_v37 }
 0x2b7   :  { %898 = vadd.xlane.f32.xlu1 %v3479_v54  ;;  %1782 = vpow2.f32 %v1064_v53 }
 0x2b8   :  { %894 = vadd.xlane.f32.xlu0 %v3480_v5  ;;  %v775_v5 = vld [vmem:[#allocation5 + $0x60] sm:$0xff] }
 0x2bb   :  { %902 = vadd.xlane.f32.xlu1 %v3481_v4  ;;  %v774_v4 = vld [vmem:[#allocation5 + $0x58] sm:$0xff] }
 0x2bc   :  { %896 = vadd.xlane.f32.xlu0 %v3482_v1 }
 0x2bf   :  { %906 = vadd.xlane.f32.xlu1 %v3483_v6 }
 0x2c0   :  { %900 = vadd.xlane.f32.xlu0 %v3484_v41 }
 0x2c4   :  { %904 = vadd.xlane.f32.xlu0 %v3485_v11  ;;  %v3508_v11 = vld [vmem:[#allocation27_spill] sm:$0xff] }
 0x2ca   :  { %v782_v62 = vpop.xlane.xlu1 %781 }
 0x2cb   :  { %v812_v25 = vadd.f32 %v782_v62, %v764_v19  ;;  %v3509_v19 = vld [vmem:[#allocation29_spill] sm:$0xff] }
 0x2cc   :  { %v3510_v62 = vsub.f32 %v3508_v11, %v3509_v19 }
 0x2cd   :  { %829 = vst.msk [vmem:[#allocation5 + $0x8] sm:$0xff] %vm3486_vm10, %v812_v25  ;;  %vm3526_vm10 = vmmov %vm3514_vm0 }
 0x2ce   :  { %v784_v27 = vpop.xlane.xlu1 %783  ;;  %v1060_v25 = vmul.f32 1.442695, %v3510_v62  ;;  %v1031_v62 = vld [vmem:[#allocation3 + $0x58] sm:$0xff] }
 0x2cf   :  { %v813_v20 = vadd.f32 %v784_v27, %v765_v40  ;;  %v851_v27 = vld [vmem:[#allocation4 + $0x38] sm:$0xff] }
 0x2d0   :  { %1784 = vpow2.f32 %v1060_v25 }
 0x2d1   :  { %830 = vst.msk [vmem:[#allocation5 + $0x10] sm:$0xff] %vm3487_vm11, %v813_v20  ;;  %v3511_v20 = vld [vmem:[#allocation32_spill] sm:$0xff]  ;;  %vm3536_vm11 = vmmov %vm3514_vm0 }
 0x2d2   :  { %v786_v24 = vpop.xlane.xlu1 %785 }
 0x2d3   :  { %v814_v15 = vadd.f32 %v786_v24, %v766_v28  ;;  %v3512_v28 = vsub.f32 %v3511_v20, %v2912_v59 }
 0x2d5   :  { %831 = vst.msk [vmem:[#allocation5 + $0x18] sm:$0xff] %vm3488_vm2, %v814_v15  ;;  %v1074_v24 = vmul.f32 1.442695, %v3512_v28  ;;  %v850_v15 = vld [vmem:[#allocation4 + $0x30] sm:$0xff]  ;;  %vm3540_vm2 = vmmov %vm3514_vm0 }
 0x2d6   :  { %v788_v43 = vpop.xlane.xlu1 %787 }
 0x2d7   :  { %v815_v29 = vadd.f32 %v788_v43, %v767_v26  ;;  %v1779_v26 = vpop.eup %1778  ;;  %1786 = vpow2.f32 %v1074_v24  ;;  %v1027_v24 = vld [vmem:[#allocation3 + $0x38] sm:$0xff] }
 0x2d8   :  { %v1393_v42 = vld [vmem:[#allocation5 + $0x10] sm:$0xff] }
 0x2d9   :  { %832 = vst.msk [vmem:[#allocation5 + $0x20] sm:$0xff] %vm3489_vm3, %v815_v29  ;;  %v1023_v29 = vld [vmem:[#allocation3 + $0x18] sm:$0xff]  ;;  %vm3544_vm3 = vmmov %vm3514_vm0 }
 0x2da   :  { %v790_v48 = vpop.xlane.xlu1 %789  ;;  %v1087_v59 = vmul.f32 %v1779_v26, %v1023_v29 }
 0x2db   :  { %v816_v36 = vadd.f32 %v790_v48, %v768_v60 }
 0x2dd   :  { %833 = vst.msk [vmem:[#allocation5 + $0x28] sm:$0xff] %vm3490_vm8, %v816_v36  ;;  %v3515_v36 = vld [vmem:[#allocation24_spill] sm:$0xff]  ;;  %vm3547_vm8 = vmmov %vm3514_vm0 }
 0x2de   :  { %v877_v50 = vpop.xlane.xlu1 %876 }
 0x2df   :  { %v908_v55 = vadd.f32 %v877_v50, %v844_v32  ;;  %v3516_v32 = vld [vmem:[#allocation26_spill] sm:$0xff] }
 0x2e0   :  { %v3517_v50 = vsub.f32 %v3515_v36, %v3516_v32  ;;  %v3542_v36 = vld [vmem:[#allocation40_spill] sm:$0xff] }
 0x2e1   :  { %924 = vst.msk [vmem:[#allocation4] sm:$0xff] %vm3491_vm4, %v908_v55  ;;  %vm3548_vm4 = vmmov %vm3514_vm0 }
 0x2e2   :  { %v794_v18 = vpop.xlane.xlu1 %793  ;;  %v1066_v55 = vmul.f32 1.442695, %v3517_v50 }
 0x2e3   :  { %v818_v39 = vadd.f32 %v794_v18, %v770_v16 }
 0x2e5   :  { %835 = vst.msk [vmem:[#allocation5 + $0x38] sm:$0xff] %vm3492_vm13, %v818_v39  ;;  %v1781_v39 = vpop.eup %1780  ;;  %vm3549_vm13 = vmmov %vm3514_vm0 }
 0x2e6   :  { %v881_v31 = vpop.xlane.xlu1 %880  ;;  %v1783_v12 = vpop.eup %1782 }
 0x2e7   :  { %v910_v63 = vadd.f32 %v881_v31, %v846_v9  ;;  %v3519_v9 = vld [vmem:[#allocation35_spill] sm:$0xff]  ;;  %v3520_v31 = vld [vmem:[#allocation37_spill] sm:$0xff]  ;;  %v1090_v44 = vmul.f32 %v1783_v12, %v1026_v49  ;;  %v1785_v37 = vpop.eup %1784 }
 0x2e9   :  { %926 = vst.msk [vmem:[#allocation4 + $0x10] sm:$0xff] %vm3493_vm15, %v910_v63  ;;  %v3521_v63 = vsub.f32 %v3519_v9, %v3520_v31  ;;  %v3162_v31 = vld [vmem:[#allocation5 + $0x8] sm:$0xff]  ;;  %vm3550_vm15 = vmmov %vm3514_vm0 }
 0x2ea   :  { %v798_v46 = vpop.xlane.xlu1 %797  ;;  %v1408_v61 = vmax.f32 %v3162_v31, 1.0 }
 0x2eb   :  { %v820_v34 = vadd.f32 %v798_v46, %v772_v2  ;;  %v1070_v2 = vmul.f32 1.442695, %v3521_v63 }
 0x2ed   :  { %837 = vst.msk [vmem:[#allocation5 + $0x48] sm:$0xff] %vm3494_vm9, %v820_v34  ;;  %v1021_v34 = vld [vmem:[#allocation3 + $0x8] sm:$0xff]  ;;  %vm3551_vm9 = vmmov %vm3514_vm0 }
 0x2ee   :  { %v885_v33 = vpop.xlane.xlu1 %884  ;;  %v1085_v13 = vmul.f32 %v1781_v39, %v1021_v34  ;;  %v1423_v34 = vld [vmem:[#allocation4] sm:$0xff] }
 0x2ef   :  { %v912_v57 = vadd.f32 %v885_v33, %v848_v38  ;;  %v1391_v38 = vld [vmem:[#allocation5] sm:$0xff] }
 0x2f0   :  { %v1407_v21 = vmax.f32 %v1391_v38, 1.0 }
 0x2f1   :  { %928 = vst.msk [vmem:[#allocation4 + $0x20] sm:$0xff] %vm3424_vm1, %v912_v57  ;;  %v3523_v57 = vld [vmem:[#allocation28_spill] sm:$0xff]  ;;  %vm3552_vm1 = vmmov %vm3514_vm0 }
 0x2f2   :  { %v3525_v0 = vsub.f32 %v3523_v57, %v3524_v35  ;;  %v3545_v57 = vld [vmem:[#allocation41_spill] sm:$0xff] }
 0x2f3   :  { %v3546_v35 = vsub.f32 %v3545_v57, %v2968_v45 }
 0x2f4   :  { %v1062_v7 = vmul.f32 1.442695, %v3525_v0 }
 0x2f5   :  { %v1076_v0 = vmul.f32 1.442695, %v3546_v35  ;;  %v1424_v35 = vld [vmem:[#allocation4 + $0x8] sm:$0xff] }
 0x30d   :  { %v1233_v47 = vpop.xlane.xlu0 %1232 }
 0x30e   :  { %v1262_v58 = vadd.f32 %v1233_v47, %v1086_v8  ;;  %v1229_v52 = vpop.xlane.xlu1 %1228  ;;  %v1072_v8 = vmul.f32 1.442695, %v3532_v51 }
 0x30f   :  { %v1260_v54 = vadd.f32 %v1229_v52, %v1084_v23  ;;  %v3533_v23 = vld [vmem:[#allocation43_spill] sm:$0xff] }
 0x310   :  { %1278 = vst.msk [vmem:[#allocation3 + $0x10] sm:$0xff] %vm3506_vm7, %v1262_v58  ;;  %v3534_v58 = vld [vmem:[#allocation44_spill] sm:$0xff]  ;;  %vm3553_vm7 = vmmov %vm3514_vm0 }
 0x311   :  { %1276 = vst.msk [vmem:[#allocation3] sm:$0xff] %vm3507_vm5, %v1260_v54  ;;  %v804_v1 = vpop.xlane.xlu0 %803  ;;  %v3535_v52 = vsub.f32 %v3533_v23, %v3534_v58  ;;  %v1024_v54 = vld [vmem:[#allocation3 + $0x20] sm:$0xff]  ;;  %vm3554_vm5 = vmmov %vm3514_vm0 }
 0x312   :  { %v823_v6 = vadd.f32 %v804_v1, %v775_v5  ;;  %v802_v41 = vpop.xlane.xlu1 %801  ;;  %v1787_v5 = vpop.eup %1786 }
 0x313   :  { %v822_v40 = vadd.f32 %v802_v41, %v774_v4  ;;  %v1078_v10 = vmul.f32 1.442695, %v3535_v52  ;;  %v3538_v41 = vld [vmem:[#allocation36_spill] sm:$0xff] }
 0x314   :  { %840 = vst.msk [vmem:[#allocation5 + $0x60] sm:$0xff] %vm3513_vm6, %v823_v6  ;;  %v3537_v6 = vld [vmem:[#allocation34_spill] sm:$0xff]  ;;  %v1033_v52 = vld [vmem:[#allocation3 + $0x68] sm:$0xff]  ;;  %vm3555_vm6 = vmmov %vm3514_vm0 }
 0x315   :  { %839 = vst.msk [vmem:[#allocation5 + $0x58] sm:$0xff] %vm3514_vm0, %v822_v40  ;;  %v891_v43 = vpop.xlane.xlu0 %890  ;;  %v3539_v11 = vsub.f32 %v3537_v6, %v3538_v41  ;;  %v1088_v40 = vmul.f32 %v1785_v37, %v1024_v54  ;;  %v1028_v41 = vld [vmem:[#allocation3 + $0x40] sm:$0xff] }
 0x316   :  { %v915_v60 = vadd.f32 %v891_v43, %v851_v27  ;;  %v889_v48 = vpop.xlane.xlu1 %888  ;;  %v1095_v43 = vmul.f32 %v1787_v5, %v1031_v62  ;;  %v1409_v5 = vmax.f32 %v1393_v42, 1.0 }
 0x317   :  { %v914_v16 = vadd.f32 %v889_v48, %v850_v15  ;;  %v1329_v47 = vld [vmem:[#allocation3 + $0x10] sm:$0xff]  ;;  %v1068_v19 = vmul.f32 1.442695, %v3539_v11  ;;  %v1311_v15 = vld [vmem:[#allocation2] sm:$0xff] }
 0x318   :  { %931 = vst.msk [vmem:[#allocation4 + $0x38] sm:$0xff] %vm3518_vm12, %v915_v60  ;;  %v1327_v18 = vld [vmem:[#allocation3] sm:$0xff]  ;;  %vm3556_vm12 = vmmov %vm3514_vm0 }
 0x319   :  { %930 = vst.msk [vmem:[#allocation4 + $0x30] sm:$0xff] %vm3522_vm14, %v914_v16  ;;  %v1235_v46 = vpop.xlane.xlu0 %1234  ;;  %1788 = vlog2.f32 %v1327_v18  ;;  %v3541_v48 = vld [vmem:[#allocation38_spill] sm:$0xff]  ;;  %v1029_v16 = vld [vmem:[#allocation3 + $0x48] sm:$0xff]  ;;  %vm3557_vm14 = vmmov %vm3514_vm0 }
 0x31a   :  { %v1263_v33 = vadd.f32 %v1235_v46, %v1087_v59  ;;  %1790 = vpow2.f32 %v1066_v55  ;;  %v3543_v32 = vsub.f32 %v3541_v48, %v3542_v36  ;;  %v1025_v46 = vld [vmem:[#allocation3 + $0x28] sm:$0xff] }
 0x31b   :  { %1792 = vpow2.f32 %v1070_v2 }
 0x31c   :  { %1279 = vst.msk [vmem:[#allocation3 + $0x18] sm:$0xff] %vm3526_vm10, %v1263_v33  ;;  %1794 = vpow2.f32 %v1062_v7  ;;  %v1080_v50 = vmul.f32 1.442695, %v3543_v32  ;;  %v776_v32 = vld [vmem:[#allocation5 + $0x68] sm:$0xff]  ;;  %vm3558_vm10 = vmmov %vm3514_vm0 }
 0x31d   :  { %v1231_v17 = vpop.xlane.xlu0 %1230  ;;  %1796 = vrcp.f32 %v1407_v21 }
 0x31e   :  { %v1261_v30 = vadd.f32 %v1231_v17, %v1085_v13  ;;  %1798 = vpow2.f32 %v1082_v22 }
 0x31f   :  { %1800 = vlog2.f32 %v1329_v47 }
 0x320   :  { %1277 = vst.msk [vmem:[#allocation3 + $0x8] sm:$0xff] %vm3536_vm11, %v1261_v30  ;;  %1802 = vpow2.f32 %v1072_v8  ;;  %vm3559_vm11 = vmmov %vm3514_vm0 }
 0x321   :  { %v1241_v53 = vpop.xlane.xlu0 %1240  ;;  %1804 = vpow2.f32 %v1078_v10 }
 0x322   :  { %v1266_v4 = vadd.f32 %v1241_v53, %v1090_v44 }
 0x323   :  { %v1789_v1 = vpop.eup %1788  ;;  %v1330_v25 = vld [vmem:[#allocation3 + $0x18] sm:$0xff] }
 0x324   :  { %1282 = vst.msk [vmem:[#allocation3 + $0x30] sm:$0xff] %vm3540_vm2, %v1266_v4  ;;  %v1344_v27 = vmul.f32 0.6931472, %v1789_v1  ;;  %v1791_v20 = vpop.eup %1790  ;;  %1806 = vlog2.f32 %v1330_v25  ;;  %v1394_v4 = vld [vmem:[#allocation5 + $0x18] sm:$0xff]  ;;  %v1313_v25 = vld [vmem:[#allocation2 + $0x10] sm:$0xff]  ;;  %vm3560_vm2 = vmmov %vm3514_vm0 }
 0x325   :  { %v1237_v28 = vpop.xlane.xlu0 %1236  ;;  %v1793_v60 = vpop.eup %1792  ;;  %1808 = vpow2.f32 %v1068_v19  ;;  %v1091_v39 = vmul.f32 %v1791_v20, %v1027_v24  ;;  %v1410_v24 = vmax.f32 %v1394_v4, 1.0 }
 0x326   :  { %v1264_v26 = vadd.f32 %v1237_v28, %v1088_v40  ;;  %v1375_v29 = vadd.f32 %v1344_v27, %v1311_v15  ;;  %v1795_v63 = vpop.eup %1794  ;;  %v1093_v13 = vmul.f32 %v1793_v60, %v1029_v16  ;;  %v1312_v60 = vld [vmem:[#allocation2 + $0x8] sm:$0xff]  ;;  %v1395_v16 = vld [vmem:[#allocation5 + $0x20] sm:$0xff] }
 0x327   :  { %v1328_v59 = vld [vmem:[#allocation3 + $0x8] sm:$0xff]  ;;  %v1797_v33 = vpop.eup %1796  ;;  %v1089_v17 = vmul.f32 %v1795_v63, %v1025_v46 }
 0x328   :  { %v1251_v55 = vpop.xlane.xlu1 %1250  ;;  %1280 = vst.msk [vmem:[#allocation3 + $0x20] sm:$0xff] %vm3544_vm3, %v1264_v26  ;;  %v1439_v9 = vmul.f32 %v1391_v38, %v1375_v29  ;;  %1810 = vlog2.f32 %v1328_v59  ;;  %v1799_v12 = vpop.eup %1798  ;;  %v1034_v29 = vld [vmem:[#allocation3 + $0x70] sm:$0xff]  ;;  %v3176_v46 = vld [vmem:[#allocation5 + $0x28] sm:$0xff]  ;;  %vm3561_vm3 = vmmov %vm3514_vm0 }
 0x329   :  { %v1271_v18 = vadd.f32 %v1251_v55, %v1095_v43  ;;  %v1243_v2 = vpop.xlane.xlu0 %1242  ;;  %1812 = vpow2.f32 %v1080_v50  ;;  %v1801_v3 = vpop.eup %1800  ;;  %v1099_v47 = vmul.f32 %v1799_v12, %v1035_v56  ;;  %v1314_v55 = vld [vmem:[#allocation2 + $0x18] sm:$0xff]  ;;  %v1032_v12 = vld [vmem:[#allocation3 + $0x60] sm:$0xff] }
 0x32a   :  { %v1267_v7 = vadd.f32 %v1243_v2, %v1091_v39  ;;  %v1455_v21 = vsub.f32 %v1423_v34, %v1439_v9  ;;  %v1803_v30 = vpop.eup %1802  ;;  %1814 = vpow2.f32 %v1076_v0  ;;  %v1348_v10 = vmul.f32 0.6931472, %v1801_v3 }
 0x32b   :  { %1287 = vst.msk [vmem:[#allocation3 + $0x58] sm:$0xff] %vm3547_vm8, %v1271_v18  ;;  %v1805_v51 = vpop.eup %1804  ;;  %1816 = vrcp.f32 %v1408_v61  ;;  %v1333_v37 = vld [vmem:[#allocation3 + $0x30] sm:$0xff]  ;;  %v1094_v54 = vmul.f32 %v1803_v30, %v1030_v14  ;;  %v1411_v0 = vmax.f32 %v1395_v16, 1.0  ;;  %vm3562_vm8 = vmmov %vm3514_vm0 }
 0x32c   :  { %v1247_v38 = vpop.xlane.xlu1 %1246  ;;  %1283 = vst.msk [vmem:[#allocation3 + $0x38] sm:$0xff] %vm3548_vm4, %v1267_v7  ;;  %v1472_v49 = vmul.f32 %v1797_v33, %v1455_v21  ;;  %v1097_v62 = vmul.f32 %v1805_v51, %v1033_v52  ;;  %v1377_v28 = vadd.f32 %v1348_v10, %v1313_v25  ;;  %v777_v21 = vld [vmem:[#allocation5 + $0x70] sm:$0xff]  ;;  %v778_v52 = vld [vmem:[#allocation5 + $0x78] sm:$0xff]  ;;  %vm3563_vm4 = vmmov %vm3514_vm0 }
 0x32d   :  { %v1269_v22 = vadd.f32 %v1247_v38, %v1093_v13  ;;  %v1239_v45 = vpop.xlane.xlu0 %1238  ;;  %v1425_v61 = vld [vmem:[#allocation4 + $0x10] sm:$0xff]  ;;  %v1426_v10 = vld [vmem:[#allocation4 + $0x18] sm:$0xff] }
 0x32e   :  { %v1265_v8 = vadd.f32 %v1239_v45, %v1089_v17  ;;  %1503 = vxpose.xlu0.b32.start [1/16] (narrow) %v1472_v49, 8  ;;  %v1807_v23 = vpop.eup %1806  ;;  %v1441_v63 = vmul.f32 %v1393_v42, %v1377_v28  ;;  %v3181_v14 = vld [vmem:[#allocation5 + $0x30] sm:$0xff]  ;;  %v855_v28 = vld [vmem:[#allocation4 + $0x58] sm:$0xff] }
 0x32f   :  { %1285 = vst.msk [vmem:[#allocation3 + $0x48] sm:$0xff] %vm3549_vm13, %v1269_v22  ;;  %v1331_v44 = vld [vmem:[#allocation3 + $0x20] sm:$0xff]  ;;  %v1809_v1 = vpop.eup %1808  ;;  %v1350_v40 = vmul.f32 0.6931472, %v1807_v23  ;;  %v1412_v22 = vmax.f32 %v3176_v46, 1.0  ;;  %vm3564_vm13 = vmmov %vm3514_vm0 }
 0x330   :  { %v1259_v58 = vpop.xlane.xlu1 %1258  ;;  %1281 = vst.msk [vmem:[#allocation3 + $0x28] sm:$0xff] %vm3550_vm15, %v1265_v8  ;;  %1818 = vlog2.f32 %v1331_v44  ;;  %v1092_v43 = vmul.f32 %v1809_v1, %v1028_v41  ;;  %v1457_v30 = vsub.f32 %v1425_v61, %v1441_v63  ;;  %v852_v1 = vld [vmem:[#allocation4 + $0x40] sm:$0xff]  ;;  %v857_v63 = vld [vmem:[#allocation4 + $0x68] sm:$0xff]  ;;  %vm3565_vm15 = vmmov %vm3514_vm0 }
 0x331   :  { %v1275_v53 = vadd.f32 %v1259_v58, %v1099_v47  ;;  %v1249_v6 = vpop.xlane.xlu0 %1248  ;;  %1820 = vlog2.f32 %v1333_v37  ;;  %v1378_v18 = vadd.f32 %v1350_v40, %v1314_v55  ;;  %v1315_v47 = vld [vmem:[#allocation2 + $0x20] sm:$0xff] }
 0x332   :  { %v1811_v11 = vpop.eup %1810  ;;  %v1270_v19 = vadd.f32 %v1249_v6, %v1094_v54  ;;  %1822 = vrcp.f32 %v1409_v5  ;;  %v1413_v5 = vmax.f32 %v3181_v14, 1.0 }
 0x333   :  { %1291 = vst.msk [vmem:[#allocation3 + $0x78] sm:$0xff] %vm3551_vm9, %v1275_v53  ;;  %v1346_v20 = vmul.f32 0.6931472, %v1811_v11  ;;  %v1334_v15 = vld [vmem:[#allocation3 + $0x38] sm:$0xff]  ;;  %v1813_v48 = vpop.eup %1812  ;;  %v1442_v3 = vmul.f32 %v1394_v4, %v1378_v18  ;;  %vm3566_vm9 = vmmov %vm3514_vm0 }
 0x334   :  { %v1255_v27 = vpop.xlane.xlu1 %1254  ;;  %1286 = vst.msk [vmem:[#allocation3 + $0x50] sm:$0xff] %vm3552_vm1, %v1270_v19  ;;  %1824 = vlog2.f32 %v1334_v15  ;;  %v1815_v34 = vpop.eup %1814  ;;  %v1098_v57 = vmul.f32 %v1813_v48, %v1034_v29  ;;  %v3186_v19 = vld [vmem:[#allocation5 + $0x38] sm:$0xff]  ;;  %v1427_v29 = vld [vmem:[#allocation4 + $0x20] sm:$0xff] }
 0x335   :  { %v1273_v26 = vadd.f32 %v1255_v27, %v1097_v62  ;;  %v1245_v36 = vpop.xlane.xlu0 %1244  ;;  %v1376_v50 = vadd.f32 %v1346_v20, %v1312_v60  ;;  %1826 = vrcp.f32 %v1410_v24  ;;  %v1817_v7 = vpop.eup %1816  ;;  %v1096_v8 = vmul.f32 %v1815_v34, %v1032_v12  ;;  %v1317_v60 = vld [vmem:[#allocation2 + $0x30] sm:$0xff]  ;;  %v1399_v34 = vld [vmem:[#allocation5 + $0x40] sm:$0xff] }
 0x336   :  { %v1268_v59 = vadd.f32 %v1245_v36, %v1092_v43  ;;  %v1336_v23 = vld [vmem:[#allocation3 + $0x48] sm:$0xff]  ;;  %v1458_v54 = vsub.f32 %v1426_v10, %v1442_v3  ;;  %v1414_v48 = vmax.f32 %v3186_v19, 1.0 }
 0x337   :  { %1289 = vst.msk [vmem:[#allocation3 + $0x68] sm:$0xff] %vm3553_vm7, %v1273_v26  ;;  %v1440_v9 = vmul.f32 %v3162_v31, %v1376_v50  ;;  %v1332_v2 = vld [vmem:[#allocation3 + $0x28] sm:$0xff] }
 0x338   :  { %v806_v39 = vpop.xlane.xlu1 %805  ;;  %1284 = vst.msk [vmem:[#allocation3 + $0x40] sm:$0xff] %vm3554_vm5, %v1268_v59  ;;  %1828 = vlog2.f32 %v1332_v2 }
 0x339   :  { %v824_v33 = vadd.f32 %v806_v39, %v776_v32  ;;  %v1257_v13 = vpop.xlane.xlu0 %1256  ;;  %v1456_v38 = vsub.f32 %v1424_v35, %v1440_v9  ;;  %1830 = vrcp.f32 %v1411_v0  ;;  %v853_v32 = vld [vmem:[#allocation4 + $0x48] sm:$0xff]  ;;  %v1318_v0 = vld [vmem:[#allocation2 + $0x38] sm:$0xff] }
 0x33a   :  { %v1819_v56 = vpop.eup %1818  ;;  %v1274_v31 = vadd.f32 %v1257_v13, %v1098_v57  ;;  %1832 = vrcp.f32 %v1412_v22  ;;  %v1316_v39 = vld [vmem:[#allocation2 + $0x28] sm:$0xff]  ;;  %v854_v13 = vld [vmem:[#allocation4 + $0x50] sm:$0xff] }
 0x33b   :  { %841 = vst.msk [vmem:[#allocation5 + $0x68] sm:$0xff] %vm3555_vm6, %v824_v33  ;;  %v1474_v49 = vmul.f32 %v1817_v7, %v1456_v38  ;;  %v1352_v45 = vmul.f32 0.6931472, %v1819_v56  ;;  %v1821_v42 = vpop.eup %1820  ;;  %1834 = vlog2.f32 %v1336_v23  ;;  %v1337_v24 = vld [vmem:[#allocation3 + $0x50] sm:$0xff]  ;;  %v1338_v33 = vld [vmem:[#allocation3 + $0x58] sm:$0xff] }
 0x33c   :  { %v808_v17 = vpop.xlane.xlu1 %807  ;;  %1290 = vst.msk [vmem:[#allocation3 + $0x70] sm:$0xff] %vm3514_vm0, %v1274_v31  ;;  %v1823_v37 = vpop.eup %1822  ;;  %v1356_v11 = vmul.f32 0.6931472, %v1821_v42  ;;  %v3195_v31 = vld [vmem:[#allocation5 + $0x48] sm:$0xff]  ;;  %v859_v42 = vld [vmem:[#allocation4 + $0x78] sm:$0xff] }
 0x33d   :  { %v825_v51 = vadd.f32 %v808_v17, %v777_v21  ;;  %v1253_v58 = vpop.xlane.xlu0 %1252  ;;  %1504 = vxpose.xlu0.b32.cont [2/16] (narrow) %v1474_v49, 8  ;;  %v1379_v44 = vadd.f32 %v1352_v45, %v1315_v47  ;;  %v1476_v6 = vmul.f32 %v1823_v37, %v1457_v30  ;;  %v1428_v17 = vld [vmem:[#allocation4 + $0x28] sm:$0xff]  ;;  %v1415_v49 = vmax.f32 %v1399_v34, 1.0 }
 0x33e   :  { %v1272_v53 = vadd.f32 %v1253_v58, %v1096_v8  ;;  %v1825_v25 = vpop.eup %1824  ;;  %v1416_v47 = vmax.f32 %v3195_v31, 1.0  ;;  %v856_v58 = vld [vmem:[#allocation4 + $0x60] sm:$0xff] }
 0x33f   :  { %842 = vst.msk [vmem:[#allocation5 + $0x70] sm:$0xff] %vm3556_vm12, %v825_v51  ;;  %v1443_v41 = vmul.f32 %v1395_v16, %v1379_v44  ;;  %v1335_v62 = vld [vmem:[#allocation3 + $0x40] sm:$0xff]  ;;  %v1827_v27 = vpop.eup %1826  ;;  %v1381_v16 = vadd.f32 %v1356_v11, %v1317_v60  ;;  %v1358_v59 = vmul.f32 0.6931472, %v1825_v25  ;;  %v1340_v11 = vld [vmem:[#allocation3 + $0x68] sm:$0xff] }
 0x340   :  { %v810_v4 = vpop.xlane.xlu1 %809  ;;  %1288 = vst.msk [vmem:[#allocation3 + $0x60] sm:$0xff] %vm3557_vm14, %v1272_v53  ;;  %1836 = vlog2.f32 %v1335_v62  ;;  %v1478_v43 = vmul.f32 %v1827_v27, %v1458_v54  ;;  %v1401_v53 = vld [vmem:[#allocation5 + $0x50] sm:$0xff] }
 0x341   :  { %v826_v40 = vadd.f32 %v810_v4, %v778_v52  ;;  %v893_v20 = vpop.xlane.xlu0 %892  ;;  %1505 = vxpose.xlu0.b32.cont [3/16] (narrow) %v1476_v6, 8  ;;  %1838 = vrcp.f32 %v1413_v5  ;;  %v1459_v50 = vsub.f32 %v1427_v29, %v1443_v41  ;;  %v1445_v38 = vmul.f32 %v3181_v14, %v1381_v16  ;;  %v1429_v14 = vld [vmem:[#allocation4 + $0x30] sm:$0xff]  ;;  %v1319_v4 = vld [vmem:[#allocation2 + $0x40] sm:$0xff] }
 0x342   :  { %v1829_v15 = vpop.eup %1828  ;;  %v916_v26 = vadd.f32 %v893_v20, %v852_v1  ;;  %1840 = vlog2.f32 %v1337_v24  ;;  %v1382_v56 = vadd.f32 %v1358_v59, %v1318_v0  ;;  %v1417_v27 = vmax.f32 %v1401_v53, 1.0 }
 0x343   :  { %843 = vst.msk [vmem:[#allocation5 + $0x78] sm:$0xff] %vm3558_vm10, %v826_v40  ;;  %v1354_v55 = vmul.f32 0.6931472, %v1829_v15  ;;  %v1831_v57 = vpop.eup %1830  ;;  %1842 = vrcp.f32 %v1414_v48  ;;  %v1461_v10 = vsub.f32 %v1429_v14, %v1445_v38  ;;  %v1430_v40 = vld [vmem:[#allocation4 + $0x38] sm:$0xff] }
 0x344   :  { %v899_v36 = vpop.xlane.xlu1 %898  ;;  %932 = vst.msk [vmem:[#allocation4 + $0x40] sm:$0xff] %vm3559_vm11, %v916_v26  ;;  %v1480_v21 = vmul.f32 %v1831_v57, %v1459_v50  ;;  %v1833_v3 = vpop.eup %1832  ;;  %1844 = vlog2.f32 %v1338_v33  ;;  %v1446_v44 = vmul.f32 %v3186_v19, %v1382_v56  ;;  %v858_v19 = vld [vmem:[#allocation4 + $0x70] sm:$0xff]  ;;  %v1320_v26 = vld [vmem:[#allocation2 + $0x48] sm:$0xff]  ;;  %v1403_v57 = vld [vmem:[#allocation5 + $0x60] sm:$0xff] }
 0x345   :  { %v919_v18 = vadd.f32 %v899_v36, %v855_v28  ;;  %v895_v9 = vpop.xlane.xlu0 %894  ;;  %1506 = vxpose.xlu0.b32.cont [4/16] (narrow) %v1478_v43, 8  ;;  %v1380_v2 = vadd.f32 %v1354_v55, %v1316_v39  ;;  %v1835_v30 = vpop.eup %1834  ;;  %v1402_v43 = vld [vmem:[#allocation5 + $0x58] sm:$0xff]  ;;  %v1341_v36 = vld [vmem:[#allocation3 + $0x70] sm:$0xff]  ;;  %v1419_v56 = vmax.f32 %v1403_v57, 1.0 }
 0x346   :  { %v917_v35 = vadd.f32 %v895_v9, %v853_v32  ;;  %v1362_v41 = vmul.f32 0.6931472, %v1835_v30  ;;  %v1462_v28 = vsub.f32 %v1430_v40, %v1446_v44  ;;  %v1322_v38 = vld [vmem:[#allocation2 + $0x58] sm:$0xff] }
 0x347   :  { %935 = vst.msk [vmem:[#allocation4 + $0x58] sm:$0xff] %vm3560_vm2, %v919_v18  ;;  %v1444_v12 = vmul.f32 %v3176_v46, %v1380_v2  ;;  %v1339_v61 = vld [vmem:[#allocation3 + $0x60] sm:$0xff]  ;;  %v1418_v18 = vmax.f32 %v1402_v43, 1.0 }
 0x348   :  { %v903_v7 = vpop.xlane.xlu1 %902  ;;  %933 = vst.msk [vmem:[#allocation4 + $0x48] sm:$0xff] %vm3561_vm3, %v917_v35  ;;  %1846 = vlog2.f32 %v1339_v61  ;;  %v1384_v60 = vadd.f32 %v1362_v41, %v1320_v26  ;;  %v1342_v35 = vld [vmem:[#allocation3 + $0x78] sm:$0xff] }
 0x349   :  { %v921_v22 = vadd.f32 %v903_v7, %v857_v63  ;;  %v897_v45 = vpop.xlane.xlu0 %896  ;;  %1507 = vxpose.xlu0.b32.cont [5/16] (narrow) %v1480_v21, 8  ;;  %v1460_v51 = vsub.f32 %v1428_v17, %v1444_v12  ;;  %1848 = vrcp.f32 %v1415_v49  ;;  %v1321_v63 = vld [vmem:[#allocation2 + $0x50] sm:$0xff]  ;;  %v1404_v17 = vld [vmem:[#allocation5 + $0x68] sm:$0xff] }
 0x34a   :  { %v1837_v8 = vpop.eup %1836  ;;  %v918_v46 = vadd.f32 %v897_v45, %v854_v13  ;;  %1850 = vrcp.f32 %v1416_v47  ;;  %v1448_v2 = vmul.f32 %v3195_v31, %v1384_v60  ;;  %v1323_v31 = vld [vmem:[#allocation2 + $0x60] sm:$0xff] }
 0x34b   :  { %937 = vst.msk [vmem:[#allocation4 + $0x68] sm:$0xff] %vm3562_vm8, %v921_v22  ;;  %v1482_v52 = vmul.f32 %v1833_v3, %v1460_v51  ;;  %v1360_v37 = vmul.f32 0.6931472, %v1837_v8  ;;  %v1839_v54 = vpop.eup %1838  ;;  %1852 = vlog2.f32 %v1340_v11  ;;  %v1431_v55 = vld [vmem:[#allocation4 + $0x40] sm:$0xff]  ;;  %v1420_v8 = vmax.f32 %v1404_v17, 1.0 }
 0x34c   :  { %v907_v23 = vpop.xlane.xlu1 %906  ;;  %934 = vst.msk [vmem:[#allocation4 + $0x50] sm:$0xff] %vm3563_vm4, %v918_v46  ;;  %v1841_v62 = vpop.eup %1840  ;;  %v1484_v20 = vmul.f32 %v1839_v54, %v1461_v10  ;;  %1854 = vrcp.f32 %v1417_v27  ;;  %v1324_v54 = vld [vmem:[#allocation2 + $0x68] sm:$0xff]  ;;  %v1325_v27 = vld [vmem:[#allocation2 + $0x70] sm:$0xff] }
 0x34d   :  { %v923_v5 = vadd.f32 %v907_v23, %v859_v42  ;;  %v901_v1 = vpop.xlane.xlu0 %900  ;;  %1508 = vxpose.xlu0.b32.cont [6/16] (narrow) %v1482_v52, 8  ;;  %v1383_v6 = vadd.f32 %v1360_v37, %v1319_v4  ;;  %v1843_v15 = vpop.eup %1842  ;;  %v1364_v48 = vmul.f32 0.6931472, %v1841_v62  ;;  %1856 = vlog2.f32 %v1341_v36  ;;  %v1405_v23 = vld [vmem:[#allocation5 + $0x70] sm:$0xff]  ;;  %v1406_v37 = vld [vmem:[#allocation5 + $0x78] sm:$0xff] }
 0x34e   :  { %v920_v25 = vadd.f32 %v901_v1, %v856_v58  ;;  %v1845_v32 = vpop.eup %1844  ;;  %v1486_v16 = vmul.f32 %v1843_v15, %v1462_v28  ;;  %1858 = vrcp.f32 %v1418_v18  ;;  %v1434_v51 = vld [vmem:[#allocation4 + $0x58] sm:$0xff]  ;;  %v1422_v11 = vmax.f32 %v1406_v37, 1.0 }
 0x34f   :  { %939 = vst.msk [vmem:[#allocation4 + $0x78] sm:$0xff] %vm3564_vm13, %v923_v5  ;;  %v1447_v24 = vmul.f32 %v1399_v34, %v1383_v6  ;;  %v1432_v9 = vld [vmem:[#allocation4 + $0x48] sm:$0xff]  ;;  %v1385_v34 = vadd.f32 %v1364_v48, %v1321_v63  ;;  %v1366_v33 = vmul.f32 0.6931472, %v1845_v32  ;;  %1860 = vlog2.f32 %v1342_v35 }
 0x350   :  { %936 = vst.msk [vmem:[#allocation4 + $0x60] sm:$0xff] %vm3565_vm15, %v920_v25  ;;  %v1464_v13 = vsub.f32 %v1432_v9, %v1448_v2  ;;  %1862 = vrcp.f32 %v1419_v56  ;;  %v1421_v5 = vmax.f32 %v1405_v23, 1.0 }
 0x351   :  { %v905_v29 = vpop.xlane.xlu0 %904  ;;  %1509 = vxpose.xlu0.b32.cont [7/16] (narrow) %v1484_v20, 8  ;;  %v1463_v59 = vsub.f32 %v1431_v55, %v1447_v24  ;;  %v1449_v3 = vmul.f32 %v1401_v53, %v1385_v34  ;;  %v1386_v22 = vadd.f32 %v1366_v33, %v1322_v38  ;;  %1864 = vrcp.f32 %v1420_v8 }
 0x352   :  { %v922_v50 = vadd.f32 %v905_v29, %v858_v19  ;;  %v1847_v39 = vpop.eup %1846  ;;  %v1436_v40 = vld [vmem:[#allocation4 + $0x68] sm:$0xff]  ;;  %1866 = vrcp.f32 %v1421_v5  ;;  %v1326_v29 = vld [vmem:[#allocation2 + $0x78] sm:$0xff] }
 0x353   :  { %v1849_v0 = vpop.eup %1848  ;;  %v1368_v21 = vmul.f32 0.6931472, %v1847_v39  ;;  %v1433_v12 = vld [vmem:[#allocation4 + $0x50] sm:$0xff]  ;;  %v1450_v14 = vmul.f32 %v1402_v43, %v1386_v22  ;;  %1868 = vrcp.f32 %v1422_v11 }
 0x354   :  { %938 = vst.msk [vmem:[#allocation4 + $0x70] sm:$0xff] %vm3566_vm9, %v922_v50  ;;  %v1488_v7 = vmul.f32 %v1849_v0, %v1463_v59  ;;  %v1851_v61 = vpop.eup %1850  ;;  %v1465_v45 = vsub.f32 %v1433_v12, %v1449_v3 }
 0x355   :  { %1510 = vxpose.xlu0.b32.cont [8/16] (narrow) %v1486_v16, 8  ;;  %v1853_v49 = vpop.eup %1852  ;;  %v1490_v30 = vmul.f32 %v1851_v61, %v1464_v13  ;;  %v1387_v42 = vadd.f32 %v1368_v21, %v1323_v31  ;;  %v1466_v10 = vsub.f32 %v1434_v51, %v1450_v14 }
 0x356   :  { %v1855_v46 = vpop.eup %1854  ;;  %v1370_v47 = vmul.f32 0.6931472, %v1853_v49  ;;  %v1438_v55 = vld [vmem:[#allocation4 + $0x78] sm:$0xff] }
 0x357   :  { %v1857_v58 = vpop.eup %1856  ;;  %v1492_v52 = vmul.f32 %v1855_v46, %v1465_v45  ;;  %v1451_v44 = vmul.f32 %v1403_v57, %v1387_v42  ;;  %v1435_v53 = vld [vmem:[#allocation4 + $0x60] sm:$0xff] }
 0x358   :  { %v1859_v4 = vpop.eup %1858  ;;  %v1388_v1 = vadd.f32 %v1370_v47, %v1324_v54  ;;  %v1372_v6 = vmul.f32 0.6931472, %v1857_v58 }
 0x359   :  { %1511 = vxpose.xlu0.b32.cont [9/16] (narrow) %v1488_v7, 8  ;;  %v1861_v41 = vpop.eup %1860  ;;  %v1494_v62 = vmul.f32 %v1859_v4, %v1466_v10  ;;  %v1467_v25 = vsub.f32 %v1435_v53, %v1451_v44 }
 0x35a   :  { %v1452_v19 = vmul.f32 %v1404_v17, %v1388_v1  ;;  %v1389_v20 = vadd.f32 %v1372_v6, %v1325_v27  ;;  %v1374_v28 = vmul.f32 0.6931472, %v1861_v41  ;;  %v1863_v24 = vpop.eup %1862 }
 0x35b   :  { %v1496_v15 = vmul.f32 %v1863_v24, %v1467_v25  ;;  %v1437_v43 = vld [vmem:[#allocation4 + $0x70] sm:$0xff]  ;;  %v1865_v36 = vpop.eup %1864 }
 0x35c   :  { %v1468_v26 = vsub.f32 %v1436_v40, %v1452_v19  ;;  %v1453_v60 = vmul.f32 %v1405_v23, %v1389_v20  ;;  %v1390_v48 = vadd.f32 %v1374_v28, %v1326_v29  ;;  %v1867_v59 = vpop.eup %1866 }
 0x35d   :  { %1512 = vxpose.xlu0.b32.cont [10/16] (narrow) %v1490_v30, 8  ;;  %v1869_v9 = vpop.eup %1868 }
 0x35e   :  { %v1498_v32 = vmul.f32 %v1865_v36, %v1468_v26  ;;  %v1469_v50 = vsub.f32 %v1437_v43, %v1453_v60  ;;  %v1454_v16 = vmul.f32 %v1406_v37, %v1390_v48 }
 0x360   :  { %v1500_v18 = vmul.f32 %v1867_v59, %v1469_v50  ;;  %v1470_v39 = vsub.f32 %v1438_v55, %v1454_v16 }
 0x361   :  { %1513 = vxpose.xlu0.b32.cont [11/16] (narrow) %v1492_v52, 8 }
 0x362   :  { %v1502_v63 = vmul.f32 %v1869_v9, %v1470_v39 }
 0x365   :  { %1514 = vxpose.xlu0.b32.cont [12/16] (narrow) %v1494_v62, 8 }
 0x369   :  { %1515 = vxpose.xlu0.b32.cont [13/16] (narrow) %v1496_v15, 8 }
 0x36d   :  { %1516 = vxpose.xlu0.b32.cont [14/16] (narrow) %v1498_v32, 8 }
 0x371   :  { %1517 = vxpose.xlu0.b32.cont [15/16] (narrow) %v1500_v18, 8 }
 0x375   :  { %1518 = vxpose.xlu0.b32.end [16/16] (narrow) %v1502_v63, 8 }
 0x3b9   :  { %v1519_v2 = vpop.trf.xlu0 }
 0x3ba   :  { %1535 = vst [vmem:[#allocation14] sm:$0x1] %v1519_v2 }
 0x3bb   :  { %1969 = shalt.err (!%p1966_p8)
}
 0x3bc   :  { %s1970_s14 = scalar_lea.hbm %s3222_s4, 16 }
 0x3bd   :  { %p1971_p9 = scmp.ne.s32.totalorder %s3222_s4, %s1970_s14  ;;  %p1974_p10 = scmp.lt.u32.totalorder %s1970_s14, %s3222_s4 }
 0x3bf   :  { %p1976_p11 = pnand %p1974_p10, %p1971_p9 }
 0x3c1   :  { %1979 = shalt.err (!%p1976_p11)
}
 0x3c2   :  { %1545 = dma.vmem_to_hbm [thread:$0]  %s1543_s27, 16, %s3222_s4, [#allocation8]  }
 0x3c3   :  { %1986 = dma.done.wait [#allocation8], 16  }
 0x3c4   :  { %1987 = vsyncadd [#allocation8], 4294967280 }
 0x3c5   :  { %1549 = vsyncpa [#allocation7], 1 }
 0x3c6   :  { %1550 = vsyncpa [#allocation10], 1 }
 0x3c7   :  { %1551 = vsyncpa [#allocation13], 1 }
 0x3c8   :  { %1552 = vsyncpa [#allocation8], 1 }

</bundles_post_ra>
